<compile_context>
chip_gen: v6e
topology: v6e:2x2x1
jax: 0.10.0
libtpu: 0.0.40
codegen_flags: <defaults>
</compile_context>

<pallas_src>
import functools

import jax
import jax.numpy as jnp
import numpy as np
from jax.experimental import pallas as pl
from jax.experimental.pallas import tpu as pltpu


# row indices inside the packed (8, H) parameter array
_B0, _BO, _G1, _BE1, _B2, _G2, _BE2 = range(7)


def critic_kernel(nhead, eps,
                  x_ref,        # (S, I)            one state (batch dim squeezed)
                  w0t_ref,      # (I, H)             fc0 weight, pre-transposed
                  wqkv3_ref,    # (3, nhead, H, dh)  per-head Q/K/V slabs (Q pre-scaled)
                  wo3_ref,      # (nhead, dh, H)     per-head out-proj slabs
                  w1t_ref,      # (H, F)             FFN linear1, pre-transposed
                  w2t_ref,      # (F, H)             FFN linear2, pre-transposed
                  wf_ref,       # (S, H)             fc1 weight reshaped to activation layout
                  pp_ref,       # (8, H)             packed b0/bo/g1/be1/b2/g2/be2
                  bqkv3_ref,    # (nhead, 3, dh)     per-head q/k/v biases (q pre-scaled)
                  b1_ref,       # (1, F)
                  bf_ref,       # (1, 1)
                  out_ref):     # (1, 1)
    S = x_ref.shape[0]
    H = w0t_ref.shape[1]

    x = x_ref[...].astype(jnp.float32)

    # ---- fc0 ----
    h0 = jnp.dot(x, w0t_ref[...], preferred_element_type=jnp.float32) \
        + pp_ref[_B0:_B0 + 1, :]

    # ---- self-attention (eval mode), fully head-batched ----
    bqkv3 = bqkv3_ref[...]                                    # (nhead, 3, dh)
    h0b = jnp.broadcast_to(h0[None, :, :], (nhead, S, H))     # replicate across heads
    qh = jnp.einsum("hsi,hid->hsd", h0b, wqkv3_ref[0],
                    preferred_element_type=jnp.float32) + bqkv3[:, 0:1, :]
    kh = jnp.einsum("hsi,hid->hsd", h0b, wqkv3_ref[1],
                    preferred_element_type=jnp.float32) + bqkv3[:, 1:2, :]
    vh = jnp.einsum("hsi,hid->hsd", h0b, wqkv3_ref[2],
                    preferred_element_type=jnp.float32) + bqkv3[:, 2:3, :]

    s = jnp.einsum("hqd,hkd->hqk", qh, kh, preferred_element_type=jnp.float32)
    s = s - jnp.max(s, axis=-1, keepdims=True)
    p = jnp.exp(s)
    p = p * pl.reciprocal(jnp.sum(p, axis=-1, keepdims=True), approx=True)
    ctx = jnp.einsum("hqk,hkd->hqd", p, vh, preferred_element_type=jnp.float32)

    # out-projection: per-head (S, dh) @ (dh, H), summed over heads -> (S, H)
    attn = jnp.sum(jnp.einsum("hsd,hdo->hso", ctx, wo3_ref[...],
                              preferred_element_type=jnp.float32), axis=0) \
        + pp_ref[_BO:_BO + 1, :]

    # ---- residual + LayerNorm1 (post-norm) ----
    r1 = h0 + attn
    mu1 = jnp.mean(r1, axis=-1, keepdims=True)
    var1 = jnp.mean((r1 - mu1) ** 2, axis=-1, keepdims=True)
    h1 = (r1 - mu1) * jax.lax.rsqrt(var1 + eps) * pp_ref[_G1:_G1 + 1, :] \
        + pp_ref[_BE1:_BE1 + 1, :]

    # ---- feed-forward ----
    ff = jnp.dot(h1, w1t_ref[...], preferred_element_type=jnp.float32) + b1_ref[...]
    ff = jnp.maximum(ff, 0.0)
    ff = jnp.dot(ff, w2t_ref[...], preferred_element_type=jnp.float32) \
        + pp_ref[_B2:_B2 + 1, :]

    # ---- residual + LayerNorm2 ----
    r2 = h1 + ff
    mu2 = jnp.mean(r2, axis=-1, keepdims=True)
    var2 = jnp.mean((r2 - mu2) ** 2, axis=-1, keepdims=True)
    h2 = (r2 - mu2) * jax.lax.rsqrt(var2 + eps) * pp_ref[_G2:_G2 + 1, :] \
        + pp_ref[_BE2:_BE2 + 1, :]

    # ---- fc1: single fused full reduction over the flattened (S, H) activation ----
    out_ref[...] = jnp.sum(h2 * wf_ref[...], keepdims=True) + bf_ref[...]


def _prep_params(p, *, nhead, seq_len):
    """Host-side (trace-time) weight re-layout; all transposes/splits happen here."""
    H = p["w0"].shape[0]
    F = p["w1"].shape[0]
    assert H % nhead == 0, "hidden_size must be divisible by nhead"
    dh = H // nhead
    scale = jnp.float32(1.0 / np.sqrt(dh))

    w0t = p["w0"].T                                            # (I, H)
    wqkv_t = p["wqkv"].T                                       # (H, 3H): cols = [Q|K|V]

    def head_split(cols):                                      # (H, H) -> (nhead, H, dh)
        return cols.reshape(H, nhead, dh).transpose(1, 0, 2)

    wqkv3 = jnp.stack([head_split(wqkv_t[:, :H] * scale),      # Q (1/sqrt(dh) folded in)
                       head_split(wqkv_t[:, H:2 * H]),         # K
                       head_split(wqkv_t[:, 2 * H:])])         # V -> (3, nhead, H, dh)

    bqkv3 = jnp.stack([(p["bqkv"][:H] * scale).reshape(nhead, dh),
                       p["bqkv"][H:2 * H].reshape(nhead, dh),
                       p["bqkv"][2 * H:].reshape(nhead, dh)], axis=1)   # (nhead, 3, dh)

    wo3 = p["wo"].T.reshape(nhead, dh, H)                      # per-head out-proj slabs
    w1t = p["w1"].T                                            # (H, F)
    w2t = p["w2"].T                                            # (F, H)
    wf = p["wfc1"].reshape(seq_len, H)                         # row-major flatten layout
    b1 = p["b1"].reshape(1, F)
    bf = p["bfc1"].reshape(1, 1)

    pp = jnp.zeros((8, H), jnp.float32).at[:7].set(
        jnp.stack([p["b0"], p["bo"], p["g1"], p["be1"],
                   p["b2"], p["g2"], p["be2"]]))               # packed small vectors

    return (w0t, wqkv3, wo3, w1t, w2t, wf, pp, bqkv3, b1, bf)


def critic_forward_batched(xb, p, *, nhead, eps=1e-5):
    """xb: (B, S, I) batch of independent states -> (B, 1) critic values."""
    B, S, I = xb.shape
    H = p["w0"].shape[0]
    F = p["w1"].shape[0]
    dh = H // nhead
    args = _prep_params(p, nhead=nhead, seq_len=S)

    def const(*shape):
        return pl.BlockSpec(shape, lambda b: (0,) * len(shape))

    kernel = functools.partial(critic_kernel, nhead, float(eps))
    out = pl.pallas_call(
        kernel,
        grid=(B,),
        out_shape=jax.ShapeDtypeStruct((B, 1, 1), jnp.float32),
        in_specs=[
            pl.BlockSpec((None, S, I), lambda b: (b, 0, 0)),   # x: one state per step
            const(I, H),                                       # W0^T
            const(3, nhead, H, dh),                            # per-head QKV slabs
            const(nhead, dh, H),                               # per-head out-proj slabs
            const(H, F),                                       # W1^T
            const(F, H),                                       # W2^T
            const(S, H),                                       # fc1 weight (reshaped)
            const(8, H),                                       # packed small vectors
            const(nhead, 3, dh),                               # per-head qkv biases
            const(1, F),                                       # b1
            const(1, 1),                                       # fc1 bias
        ],
        out_specs=pl.BlockSpec((None, 1, 1), lambda b: (b, 0, 0)),
        compiler_params=pltpu.CompilerParams(
            dimension_semantics=("parallel",)),
    )(xb, *args)
    return out.reshape(B, 1)


def critic_forward(x, p, *, nhead, eps=1e-5):
    """x: (S, I) single state -> (1,) critic value (matches the PyTorch forward)."""
    return critic_forward_batched(x[None], p, nhead=nhead, eps=eps)[0]


def init_params(key, input_size, hidden_size, seq_len, dim_ff, scale=0.05):
    ks = jax.random.split(key, 16)
    n = lambda k, s: (scale * jax.random.normal(k, s)).astype(jnp.float32)
    H, I, F, S = hidden_size, input_size, dim_ff, seq_len
    return {
        "w0": n(ks[0], (H, I)),       "b0": n(ks[1], (H,)),
        "wqkv": n(ks[2], (3 * H, H)), "bqkv": n(ks[3], (3 * H,)),
        "wo": n(ks[4], (H, H)),       "bo": n(ks[5], (H,)),
        "g1": jnp.ones((H,), jnp.float32) + n(ks[6], (H,)),
        "be1": n(ks[7], (H,)),
        "w1": n(ks[8], (F, H)),       "b1": n(ks[9], (F,)),
        "w2": n(ks[10], (H, F)),      "b2": n(ks[11], (H,)),
        "g2": jnp.ones((H,), jnp.float32) + n(ks[12], (H,)),
        "be2": n(ks[13], (H,)),
        "wfc1": n(ks[14], (1, S * H)),
        "bfc1": n(ks[15], (1,)),
    }


def critic_reference(x, p, *, nhead, eps=1e-5):
    """Pure-JAX mirror of the PyTorch forward (eval mode) for verification."""
    S = x.shape[0]
    H = p["w0"].shape[0]
    dh = H // nhead
    h0 = x @ p["w0"].T + p["b0"]
    qkv = h0 @ p["wqkv"].T + p["bqkv"]
    q, k, v = qkv[:, :H], qkv[:, H:2 * H], qkv[:, 2 * H:]
    qh = q.reshape(S, nhead, dh).transpose(1, 0, 2) / np.sqrt(dh)
    kh = k.reshape(S, nhead, dh).transpose(1, 0, 2)
    vh = v.reshape(S, nhead, dh).transpose(1, 0, 2)
    s = jnp.einsum("hqd,hkd->hqk", qh, kh)
    pm = jax.nn.softmax(s, axis=-1)
    ctx = jnp.einsum("hqk,hkd->hqd", pm, vh).transpose(1, 0, 2).reshape(S, H)
    attn = ctx @ p["wo"].T + p["bo"]

    def ln(z, g, b):
        mu = z.mean(-1, keepdims=True)
        var = ((z - mu) ** 2).mean(-1, keepdims=True)
        return (z - mu) / jnp.sqrt(var + eps) * g + b

    h1 = ln(h0 + attn, p["g1"], p["be1"])
    ff = jnp.maximum(h1 @ p["w1"].T + p["b1"], 0.0) @ p["w2"].T + p["b2"]
    h2 = ln(h1 + ff, p["g2"], p["be2"])
    return h2.reshape(-1) @ p["wfc1"][0] + p["bfc1"]


if __name__ == "__main__":
    # small, self-consistent shapes (PyTorch defaults scaled down)
    input_size, hidden_size, seq_len, nhead, dim_ff = 5, 32, 8, 8, 64
    batch = 4

    key = jax.random.PRNGKey(0)
    k_x, k_p = jax.random.split(key)
    xb = jax.random.normal(k_x, (batch, seq_len, input_size), jnp.float32)
    params = init_params(k_p, input_size, hidden_size, seq_len, dim_ff)

    # single state (exactly the PyTorch module's forward signature / output shape (1,))
    out1 = jax.block_until_ready(critic_forward(xb[0], params, nhead=nhead))
    ref1 = critic_reference(xb[0], params, nhead=nhead)
    np.testing.assert_allclose(np.asarray(out1), np.asarray(ref1), rtol=3e-3, atol=3e-3)

    # batch of independent states through a single pallas_call (parallel grid)
    outb = jax.block_until_ready(critic_forward_batched(xb, params, nhead=nhead))
    refb = jnp.stack([critic_reference(xb[i], params, nhead=nhead) for i in range(batch)])
    np.testing.assert_allclose(np.asarray(outb), np.asarray(refb), rtol=3e-3, atol=3e-3)

    print("KERNEL_OK")
</pallas_src>

<mosaic_0001>
module attributes {stable_mosaic.version = 11 : i64} {
  func.func @critic_kernel(%arg0: i32, %arg1: memref<1x8x5xf32, #tpu.memory_space<vmem>>, %arg2: memref<5x32xf32, #tpu.memory_space<vmem>>, %arg3: memref<3x8x32x4xf32, #tpu.memory_space<vmem>>, %arg4: memref<8x4x32xf32, #tpu.memory_space<vmem>>, %arg5: memref<32x64xf32, #tpu.memory_space<vmem>>, %arg6: memref<64x32xf32, #tpu.memory_space<vmem>>, %arg7: memref<8x32xf32, #tpu.memory_space<vmem>>, %arg8: memref<8x32xf32, #tpu.memory_space<vmem>>, %arg9: memref<8x3x4xf32, #tpu.memory_space<vmem>>, %arg10: memref<1x64xf32, #tpu.memory_space<vmem>>, %arg11: memref<1x1xf32, #tpu.memory_space<vmem>>, %arg12: memref<1x1x1xf32, #tpu.memory_space<vmem>>) attributes {dimension_semantics = [#tpu.dimension_semantics<parallel>], iteration_bounds = array<i64: 1>, scalar_prefetch = 0 : i64, scratch_operands = 0 : i64, tpu.core_type = #tpu.core_type<tc>, window_params = [{transform_indices = @transform_0, window_bounds = array<i64: 1, 8, 5>}, {pipeline_mode = #tpu.pipeline_mode<synchronous>, transform_indices = @transform_1, window_bounds = array<i64: 5, 32>}, {pipeline_mode = #tpu.pipeline_mode<synchronous>, transform_indices = @transform_2, window_bounds = array<i64: 3, 8, 32, 4>}, {pipeline_mode = #tpu.pipeline_mode<synchronous>, transform_indices = @transform_3, window_bounds = array<i64: 8, 4, 32>}, {pipeline_mode = #tpu.pipeline_mode<synchronous>, transform_indices = @transform_4, window_bounds = array<i64: 32, 64>}, {pipeline_mode = #tpu.pipeline_mode<synchronous>, transform_indices = @transform_5, window_bounds = array<i64: 64, 32>}, {pipeline_mode = #tpu.pipeline_mode<synchronous>, transform_indices = @transform_6, window_bounds = array<i64: 8, 32>}, {pipeline_mode = #tpu.pipeline_mode<synchronous>, transform_indices = @transform_7, window_bounds = array<i64: 8, 32>}, {pipeline_mode = #tpu.pipeline_mode<synchronous>, transform_indices = @transform_8, window_bounds = array<i64: 8, 3, 4>}, {pipeline_mode = #tpu.pipeline_mode<synchronous>, transform_indices = @transform_9, window_bounds = array<i64: 1, 64>}, {pipeline_mode = #tpu.pipeline_mode<synchronous>, transform_indices = @transform_10, window_bounds = array<i64: 1, 1>}, {transform_indices = @transform_11, window_bounds = array<i64: 1, 1, 1>}]} {
    %c0 = arith.constant 0 : index
    %c0_0 = arith.constant 0 : index
    %c0_1 = arith.constant 0 : index
    %0 = vector.load %arg1[%c0, %c0_0, %c0_1] : memref<1x8x5xf32, #tpu.memory_space<vmem>>, vector<1x8x5xf32>
    %1 = vector.shape_cast %0 : vector<1x8x5xf32> to vector<8x5xf32>
    %c0_2 = arith.constant 0 : index
    %c0_3 = arith.constant 0 : index
    %2 = vector.load %arg2[%c0_2, %c0_3] : memref<5x32xf32, #tpu.memory_space<vmem>>, vector<5x32xf32>
    %cst = arith.constant dense<0.000000e+00> : vector<8x32xf32>
    %3 = tpu.matmul %1, %2, %cst {dimension_numbers = #tpu.dot_dimension_numbers<[1], [0], [0], [1], [0, 0, 1, 1], [], []>} : vector<8x5xf32>, vector<5x32xf32>, vector<8x32xf32> -> vector<8x32xf32>
    %c0_4 = arith.constant 0 : index
    %c0_5 = arith.constant 0 : index
    %4 = vector.load %arg8[%c0_4, %c0_5] : memref<8x32xf32, #tpu.memory_space<vmem>>, vector<1x32xf32>
    %5 = vector.broadcast %4 : vector<1x32xf32> to vector<8x32xf32>
    %6 = arith.addf %3, %5 : vector<8x32xf32>
    %c0_6 = arith.constant 0 : index
    %c0_7 = arith.constant 0 : index
    %c0_8 = arith.constant 0 : index
    %7 = vector.load %arg9[%c0_6, %c0_7, %c0_8] : memref<8x3x4xf32, #tpu.memory_space<vmem>>, vector<8x3x4xf32>
    %8 = vector.shape_cast %6 : vector<8x32xf32> to vector<1x8x32xf32>
    %9 = vector.shape_cast %8 : vector<1x8x32xf32> to vector<1x8x32xf32>
    %10 = vector.broadcast %9 : vector<1x8x32xf32> to vector<8x8x32xf32>
    %c0_9 = arith.constant 0 : index
    %c0_10 = arith.constant 0 : index
    %c0_11 = arith.constant 0 : index
    %c0_12 = arith.constant 0 : index
    %11 = vector.load %arg3[%c0_9, %c0_10, %c0_11, %c0_12] : memref<3x8x32x4xf32, #tpu.memory_space<vmem>>, vector<1x8x32x4xf32>
    %12 = vector.shape_cast %11 : vector<1x8x32x4xf32> to vector<8x32x4xf32>
    "tpu.trace_start"() <{level = 10 : i32, message = "hsi,hid->hsd"}> : () -> ()
    %cst_13 = arith.constant dense<0.000000e+00> : vector<8x8x4xf32>
    %13 = tpu.matmul %10, %12, %cst_13 {dimension_numbers = #tpu.dot_dimension_numbers<[2], [1], [1], [2], [0, 0, 0, 1, 1, 2], [0], [0]>} : vector<8x8x32xf32>, vector<8x32x4xf32>, vector<8x8x4xf32> -> vector<8x8x4xf32>
    "tpu.trace_stop"() : () -> ()
    %14 = vector.extract_strided_slice %7 {offsets = [0, 0, 0], sizes = [8, 1, 4], strides = [1, 1, 1]} : vector<8x3x4xf32> to vector<8x1x4xf32>
    %15 = vector.broadcast %14 : vector<8x1x4xf32> to vector<8x8x4xf32>
    %16 = arith.addf %13, %15 : vector<8x8x4xf32>
    %c1 = arith.constant 1 : index
    %c0_14 = arith.constant 0 : index
    %c0_15 = arith.constant 0 : index
    %c0_16 = arith.constant 0 : index
    %17 = vector.load %arg3[%c1, %c0_14, %c0_15, %c0_16] : memref<3x8x32x4xf32, #tpu.memory_space<vmem>>, vector<1x8x32x4xf32>
    %18 = vector.shape_cast %17 : vector<1x8x32x4xf32> to vector<8x32x4xf32>
    "tpu.trace_start"() <{level = 10 : i32, message = "hsi,hid->hsd"}> : () -> ()
    %cst_17 = arith.constant dense<0.000000e+00> : vector<8x8x4xf32>
    %19 = tpu.matmul %10, %18, %cst_17 {dimension_numbers = #tpu.dot_dimension_numbers<[2], [1], [1], [2], [0, 0, 0, 1, 1, 2], [0], [0]>} : vector<8x8x32xf32>, vector<8x32x4xf32>, vector<8x8x4xf32> -> vector<8x8x4xf32>
    "tpu.trace_stop"() : () -> ()
    %20 = vector.extract_strided_slice %7 {offsets = [0, 1, 0], sizes = [8, 1, 4], strides = [1, 1, 1]} : vector<8x3x4xf32> to vector<8x1x4xf32>
    %21 = vector.broadcast %20 : vector<8x1x4xf32> to vector<8x8x4xf32>
    %22 = arith.addf %19, %21 : vector<8x8x4xf32>
    %c2 = arith.constant 2 : index
    %c0_18 = arith.constant 0 : index
    %c0_19 = arith.constant 0 : index
    %c0_20 = arith.constant 0 : index
    %23 = vector.load %arg3[%c2, %c0_18, %c0_19, %c0_20] : memref<3x8x32x4xf32, #tpu.memory_space<vmem>>, vector<1x8x32x4xf32>
    %24 = vector.shape_cast %23 : vector<1x8x32x4xf32> to vector<8x32x4xf32>
    "tpu.trace_start"() <{level = 10 : i32, message = "hsi,hid->hsd"}> : () -> ()
    %cst_21 = arith.constant dense<0.000000e+00> : vector<8x8x4xf32>
    %25 = tpu.matmul %10, %24, %cst_21 {dimension_numbers = #tpu.dot_dimension_numbers<[2], [1], [1], [2], [0, 0, 0, 1, 1, 2], [0], [0]>} : vector<8x8x32xf32>, vector<8x32x4xf32>, vector<8x8x4xf32> -> vector<8x8x4xf32>
    "tpu.trace_stop"() : () -> ()
    %26 = vector.extract_strided_slice %7 {offsets = [0, 2, 0], sizes = [8, 1, 4], strides = [1, 1, 1]} : vector<8x3x4xf32> to vector<8x1x4xf32>
    %27 = vector.broadcast %26 : vector<8x1x4xf32> to vector<8x8x4xf32>
    %28 = arith.addf %25, %27 : vector<8x8x4xf32>
    "tpu.trace_start"() <{level = 10 : i32, message = "hqd,hkd->hqk"}> : () -> ()
    %cst_22 = arith.constant dense<0.000000e+00> : vector<8x8x8xf32>
    %29 = tpu.matmul %16, %22, %cst_22 {dimension_numbers = #tpu.dot_dimension_numbers<[2], [2], [1], [1], [0, 0, 0, 1, 1, 1], [0], [0]>} : vector<8x8x4xf32>, vector<8x8x4xf32>, vector<8x8x8xf32> -> vector<8x8x8xf32>
    "tpu.trace_stop"() : () -> ()
    %cst_23 = arith.constant dense<0xFF800000> : vector<8x8xf32>
    %30 = vector.multi_reduction <maximumf>, %29, %cst_23 [2] : vector<8x8x8xf32> to vector<8x8xf32>
    %31 = vector.shape_cast %30 : vector<8x8xf32> to vector<8x8x1xf32>
    %32 = vector.broadcast %31 : vector<8x8x1xf32> to vector<8x8x8xf32>
    %33 = arith.subf %29, %32 : vector<8x8x8xf32>
    %34 = math.exp %33 : vector<8x8x8xf32>
    %cst_24 = arith.constant dense<0.000000e+00> : vector<8x8xf32>
    %35 = vector.multi_reduction <add>, %34, %cst_24 [2] : vector<8x8x8xf32> to vector<8x8xf32>
    %36 = vector.shape_cast %35 : vector<8x8xf32> to vector<8x8x1xf32>
    %37 = tpu.reciprocal %36 {approx = true} : vector<8x8x1xf32> -> vector<8x8x1xf32>
    %38 = vector.broadcast %37 : vector<8x8x1xf32> to vector<8x8x8xf32>
    %39 = arith.mulf %34, %38 : vector<8x8x8xf32>
    "tpu.trace_start"() <{level = 10 : i32, message = "hqk,hkd->hqd"}> : () -> ()
    %cst_25 = arith.constant dense<0.000000e+00> : vector<8x8x4xf32>
    %40 = tpu.matmul %39, %28, %cst_25 {dimension_numbers = #tpu.dot_dimension_numbers<[2], [1], [1], [2], [0, 0, 0, 1, 1, 2], [0], [0]>} : vector<8x8x8xf32>, vector<8x8x4xf32>, vector<8x8x4xf32> -> vector<8x8x4xf32>
    "tpu.trace_stop"() : () -> ()
    %c0_26 = arith.constant 0 : index
    %c0_27 = arith.constant 0 : index
    %c0_28 = arith.constant 0 : index
    %41 = vector.load %arg4[%c0_26, %c0_27, %c0_28] : memref<8x4x32xf32, #tpu.memory_space<vmem>>, vector<8x4x32xf32>
    "tpu.trace_start"() <{level = 10 : i32, message = "hsd,hdo->hso"}> : () -> ()
    %cst_29 = arith.constant dense<0.000000e+00> : vector<8x8x32xf32>
    %42 = tpu.matmul %40, %41, %cst_29 {dimension_numbers = #tpu.dot_dimension_numbers<[2], [1], [1], [2], [0, 0, 0, 1, 1, 2], [0], [0]>} : vector<8x8x4xf32>, vector<8x4x32xf32>, vector<8x8x32xf32> -> vector<8x8x32xf32>
    "tpu.trace_stop"() : () -> ()
    %cst_30 = arith.constant dense<0.000000e+00> : vector<8x32xf32>
    %43 = vector.multi_reduction <add>, %42, %cst_30 [0] : vector<8x8x32xf32> to vector<8x32xf32>
    %c1_31 = arith.constant 1 : index
    %c0_32 = arith.constant 0 : index
    %44 = vector.load %arg8[%c1_31, %c0_32] : memref<8x32xf32, #tpu.memory_space<vmem>>, vector<1x32xf32>
    %45 = vector.broadcast %44 : vector<1x32xf32> to vector<8x32xf32>
    %46 = arith.addf %43, %45 : vector<8x32xf32>
    %47 = arith.addf %6, %46 : vector<8x32xf32>
    %cst_33 = arith.constant dense<0.000000e+00> : vector<8xf32>
    %48 = vector.multi_reduction <add>, %47, %cst_33 [1] : vector<8x32xf32> to vector<8xf32>
    %49 = vector.shape_cast %48 : vector<8xf32> to vector<8x1xf32>
    %cst_34 = arith.constant 3.200000e+01 : f32
    %50 = vector.broadcast %cst_34 : f32 to vector<8x1xf32>
    %51 = arith.divf %49, %50 : vector<8x1xf32>
    %52 = vector.broadcast %51 : vector<8x1xf32> to vector<8x32xf32>
    %53 = arith.subf %47, %52 : vector<8x32xf32>
    %54 = arith.mulf %53, %53 : vector<8x32xf32>
    %cst_35 = arith.constant dense<0.000000e+00> : vector<8xf32>
    %55 = vector.multi_reduction <add>, %54, %cst_35 [1] : vector<8x32xf32> to vector<8xf32>
    %56 = vector.shape_cast %55 : vector<8xf32> to vector<8x1xf32>
    %cst_36 = arith.constant 3.200000e+01 : f32
    %57 = vector.broadcast %cst_36 : f32 to vector<8x1xf32>
    %58 = arith.divf %56, %57 : vector<8x1xf32>
    %59 = vector.broadcast %51 : vector<8x1xf32> to vector<8x32xf32>
    %60 = arith.subf %47, %59 : vector<8x32xf32>
    %cst_37 = arith.constant 9.99999974E-6 : f32
    %61 = vector.broadcast %cst_37 : f32 to vector<8x1xf32>
    %62 = arith.addf %58, %61 : vector<8x1xf32>
    %63 = math.rsqrt %62 : vector<8x1xf32>
    %64 = vector.broadcast %63 : vector<8x1xf32> to vector<8x32xf32>
    %65 = arith.mulf %60, %64 : vector<8x32xf32>
    %c2_38 = arith.constant 2 : index
    %c0_39 = arith.constant 0 : index
    %66 = vector.load %arg8[%c2_38, %c0_39] : memref<8x32xf32, #tpu.memory_space<vmem>>, vector<1x32xf32>
    %67 = vector.broadcast %66 : vector<1x32xf32> to vector<8x32xf32>
    %68 = arith.mulf %65, %67 : vector<8x32xf32>
    %c3 = arith.constant 3 : index
    %c0_40 = arith.constant 0 : index
    %69 = vector.load %arg8[%c3, %c0_40] : memref<8x32xf32, #tpu.memory_space<vmem>>, vector<1x32xf32>
    %70 = vector.broadcast %69 : vector<1x32xf32> to vector<8x32xf32>
    %71 = arith.addf %68, %70 : vector<8x32xf32>
    %c0_41 = arith.constant 0 : index
    %c0_42 = arith.constant 0 : index
    %72 = vector.load %arg5[%c0_41, %c0_42] : memref<32x64xf32, #tpu.memory_space<vmem>>, vector<32x64xf32>
    %cst_43 = arith.constant dense<0.000000e+00> : vector<8x64xf32>
    %73 = tpu.matmul %71, %72, %cst_43 {dimension_numbers = #tpu.dot_dimension_numbers<[1], [0], [0], [1], [0, 0, 1, 1], [], []>} : vector<8x32xf32>, vector<32x64xf32>, vector<8x64xf32> -> vector<8x64xf32>
    %c0_44 = arith.constant 0 : index
    %c0_45 = arith.constant 0 : index
    %74 = vector.load %arg10[%c0_44, %c0_45] : memref<1x64xf32, #tpu.memory_space<vmem>>, vector<1x64xf32>
    %75 = vector.broadcast %74 : vector<1x64xf32> to vector<8x64xf32>
    %76 = arith.addf %73, %75 : vector<8x64xf32>
    %cst_46 = arith.constant 0.000000e+00 : f32
    %77 = vector.broadcast %cst_46 : f32 to vector<8x64xf32>
    %78 = arith.maximumf %76, %77 : vector<8x64xf32>
    %c0_47 = arith.constant 0 : index
    %c0_48 = arith.constant 0 : index
    %79 = vector.load %arg6[%c0_47, %c0_48] : memref<64x32xf32, #tpu.memory_space<vmem>>, vector<64x32xf32>
    %cst_49 = arith.constant dense<0.000000e+00> : vector<8x32xf32>
    %80 = tpu.matmul %78, %79, %cst_49 {dimension_numbers = #tpu.dot_dimension_numbers<[1], [0], [0], [1], [0, 0, 1, 1], [], []>} : vector<8x64xf32>, vector<64x32xf32>, vector<8x32xf32> -> vector<8x32xf32>
    %c4 = arith.constant 4 : index
    %c0_50 = arith.constant 0 : index
    %81 = vector.load %arg8[%c4, %c0_50] : memref<8x32xf32, #tpu.memory_space<vmem>>, vector<1x32xf32>
    %82 = vector.broadcast %81 : vector<1x32xf32> to vector<8x32xf32>
    %83 = arith.addf %80, %82 : vector<8x32xf32>
    %84 = arith.addf %71, %83 : vector<8x32xf32>
    %cst_51 = arith.constant dense<0.000000e+00> : vector<8xf32>
    %85 = vector.multi_reduction <add>, %84, %cst_51 [1] : vector<8x32xf32> to vector<8xf32>
    %86 = vector.shape_cast %85 : vector<8xf32> to vector<8x1xf32>
    %cst_52 = arith.constant 3.200000e+01 : f32
    %87 = vector.broadcast %cst_52 : f32 to vector<8x1xf32>
    %88 = arith.divf %86, %87 : vector<8x1xf32>
    %89 = vector.broadcast %88 : vector<8x1xf32> to vector<8x32xf32>
    %90 = arith.subf %84, %89 : vector<8x32xf32>
    %91 = arith.mulf %90, %90 : vector<8x32xf32>
    %cst_53 = arith.constant dense<0.000000e+00> : vector<8xf32>
    %92 = vector.multi_reduction <add>, %91, %cst_53 [1] : vector<8x32xf32> to vector<8xf32>
    %93 = vector.shape_cast %92 : vector<8xf32> to vector<8x1xf32>
    %cst_54 = arith.constant 3.200000e+01 : f32
    %94 = vector.broadcast %cst_54 : f32 to vector<8x1xf32>
    %95 = arith.divf %93, %94 : vector<8x1xf32>
    %96 = vector.broadcast %88 : vector<8x1xf32> to vector<8x32xf32>
    %97 = arith.subf %84, %96 : vector<8x32xf32>
    %cst_55 = arith.constant 9.99999974E-6 : f32
    %98 = vector.broadcast %cst_55 : f32 to vector<8x1xf32>
    %99 = arith.addf %95, %98 : vector<8x1xf32>
    %100 = math.rsqrt %99 : vector<8x1xf32>
    %101 = vector.broadcast %100 : vector<8x1xf32> to vector<8x32xf32>
    %102 = arith.mulf %97, %101 : vector<8x32xf32>
    %c5 = arith.constant 5 : index
    %c0_56 = arith.constant 0 : index
    %103 = vector.load %arg8[%c5, %c0_56] : memref<8x32xf32, #tpu.memory_space<vmem>>, vector<1x32xf32>
    %104 = vector.broadcast %103 : vector<1x32xf32> to vector<8x32xf32>
    %105 = arith.mulf %102, %104 : vector<8x32xf32>
    %c6 = arith.constant 6 : index
    %c0_57 = arith.constant 0 : index
    %106 = vector.load %arg8[%c6, %c0_57] : memref<8x32xf32, #tpu.memory_space<vmem>>, vector<1x32xf32>
    %107 = vector.broadcast %106 : vector<1x32xf32> to vector<8x32xf32>
    %108 = arith.addf %105, %107 : vector<8x32xf32>
    %c0_58 = arith.constant 0 : index
    %c0_59 = arith.constant 0 : index
    %109 = vector.load %arg7[%c0_58, %c0_59] : memref<8x32xf32, #tpu.memory_space<vmem>>, vector<8x32xf32>
    %110 = arith.mulf %108, %109 : vector<8x32xf32>
    %111 = vector.shape_cast %110 : vector<8x32xf32> to vector<1x8x32xf32>
    %cst_60 = arith.constant dense<0.000000e+00> : vector<1xf32>
    %112 = vector.multi_reduction <add>, %111, %cst_60 [1, 2] : vector<1x8x32xf32> to vector<1xf32>
    %113 = vector.shape_cast %112 : vector<1xf32> to vector<1x1x1xf32>
    %114 = vector.extract %113[0, 0, 0] : f32 from vector<1x1x1xf32>
    %115 = vector.broadcast %114 : f32 to vector<1x1xf32>
    %c0_61 = arith.constant 0 : index
    %c0_62 = arith.constant 0 : index
    %116 = vector.load %arg11[%c0_61, %c0_62] : memref<1x1xf32, #tpu.memory_space<vmem>>, vector<1x1xf32>
    %117 = arith.addf %115, %116 : vector<1x1xf32>
    %c0_63 = arith.constant 0 : index
    %c0_64 = arith.constant 0 : index
    %c0_65 = arith.constant 0 : index
    %118 = vector.load %arg12[%c0_63, %c0_64, %c0_65] : memref<1x1x1xf32, #tpu.memory_space<vmem>>, vector<1x1x1xf32>
    %119 = vector.shape_cast %118 : vector<1x1x1xf32> to vector<1x1xf32>
    %120 = vector.shape_cast %117 : vector<1x1xf32> to vector<1x1x1xf32>
    tpu.vector_store %arg12[%c0_63, %c0_64, %c0_65], %120 {strides = array<i32>} : memref<1x1x1xf32, #tpu.memory_space<vmem>>, vector<1x1x1xf32>,
    return
  }
  func.func @transform_0(%arg0: i32) -> (i32, i32, i32) {
    %c0_i32 = arith.constant 0 : i32
    %c0_i32_0 = arith.constant 0 : i32
    %c0_i32_1 = arith.constant 0 : i32
    return %arg0, %c0_i32, %c0_i32_0 : i32, i32, i32
  }
  func.func @transform_1(%arg0: i32) -> (i32, i32) {
    %c0_i32 = arith.constant 0 : i32
    %c0_i32_0 = arith.constant 0 : i32
    %c0_i32_1 = arith.constant 0 : i32
    return %c0_i32, %c0_i32_0 : i32, i32
  }
  func.func @transform_2(%arg0: i32) -> (i32, i32, i32, i32) {
    %c0_i32 = arith.constant 0 : i32
    %c0_i32_0 = arith.constant 0 : i32
    %c0_i32_1 = arith.constant 0 : i32
    %c0_i32_2 = arith.constant 0 : i32
    %c0_i32_3 = arith.constant 0 : i32
    return %c0_i32, %c0_i32_0, %c0_i32_1, %c0_i32_2 : i32, i32, i32, i32
  }
  func.func @transform_3(%arg0: i32) -> (i32, i32, i32) {
    %c0_i32 = arith.constant 0 : i32
    %c0_i32_0 = arith.constant 0 : i32
    %c0_i32_1 = arith.constant 0 : i32
    %c0_i32_2 = arith.constant 0 : i32
    return %c0_i32, %c0_i32_0, %c0_i32_1 : i32, i32, i32
  }
  func.func @transform_4(%arg0: i32) -> (i32, i32) {
    %c0_i32 = arith.constant 0 : i32
    %c0_i32_0 = arith.constant 0 : i32
    %c0_i32_1 = arith.constant 0 : i32
    return %c0_i32, %c0_i32_0 : i32, i32
  }
  func.func @transform_5(%arg0: i32) -> (i32, i32) {
    %c0_i32 = arith.constant 0 : i32
    %c0_i32_0 = arith.constant 0 : i32
    %c0_i32_1 = arith.constant 0 : i32
    return %c0_i32, %c0_i32_0 : i32, i32
  }
  func.func @transform_6(%arg0: i32) -> (i32, i32) {
    %c0_i32 = arith.constant 0 : i32
    %c0_i32_0 = arith.constant 0 : i32
    %c0_i32_1 = arith.constant 0 : i32
    return %c0_i32, %c0_i32_0 : i32, i32
  }
  func.func @transform_7(%arg0: i32) -> (i32, i32) {
    %c0_i32 = arith.constant 0 : i32
    %c0_i32_0 = arith.constant 0 : i32
    %c0_i32_1 = arith.constant 0 : i32
    return %c0_i32, %c0_i32_0 : i32, i32
  }
  func.func @transform_8(%arg0: i32) -> (i32, i32, i32) {
    %c0_i32 = arith.constant 0 : i32
    %c0_i32_0 = arith.constant 0 : i32
    %c0_i32_1 = arith.constant 0 : i32
    %c0_i32_2 = arith.constant 0 : i32
    return %c0_i32, %c0_i32_0, %c0_i32_1 : i32, i32, i32
  }
  func.func @transform_9(%arg0: i32) -> (i32, i32) {
    %c0_i32 = arith.constant 0 : i32
    %c0_i32_0 = arith.constant 0 : i32
    %c0_i32_1 = arith.constant 0 : i32
    return %c0_i32, %c0_i32_0 : i32, i32
  }
  func.func @transform_10(%arg0: i32) -> (i32, i32) {
    %c0_i32 = arith.constant 0 : i32
    %c0_i32_0 = arith.constant 0 : i32
    %c0_i32_1 = arith.constant 0 : i32
    return %c0_i32, %c0_i32_0 : i32, i32
  }
  func.func @transform_11(%arg0: i32) -> (i32, i32, i32) {
    %c0_i32 = arith.constant 0 : i32
    %c0_i32_0 = arith.constant 0 : i32
    %c0_i32_1 = arith.constant 0 : i32
    return %arg0, %c0_i32, %c0_i32_0 : i32, i32, i32
  }
}

</mosaic_0001>

<bundles_post_ra>
// kernel: tpu_custom_call.1
= control target key start
LH: loop header
LB: loop body
LE: loop exit
PB: predicated region body
PF: predicated region fallthrough
CT: control target
= control target key end

     0   :  { %s5909_s0 = inlined_call_operand.vmem [shape: f32[1,8,5], index: 0, kind: input, shape index: {}]   ;;  %s5910_s1 = inlined_call_operand.vmem [shape: f32[5,32], index: 1, kind: input, shape index: {}]   ;;  %s5911_s2 = inlined_call_operand.vmem [shape: f32[3,8,32,4], index: 2, kind: input, shape index: {}]   ;;  %s5912_s3 = inlined_call_operand.vmem [shape: f32[8,4,32], index: 3, kind: input, shape index: {}]   ;;  %s5913_s4 = inlined_call_operand.vmem [shape: f32[32,64], index: 4, kind: input, shape index: {}]   ;;  %s5914_s5 = inlined_call_operand.vmem [shape: f32[64,32], index: 5, kind: input, shape index: {}]   ;;  %s5915_s6 = inlined_call_operand.vmem [shape: f32[8,32], index: 6, kind: input, shape index: {}]   ;;  %s5916_s7 = inlined_call_operand.vmem [shape: f32[8,32], index: 7, kind: input, shape index: {}]   ;;  %s5917_s8 = inlined_call_operand.vmem [shape: f32[8,3,4], index: 8, kind: input, shape index: {}]   ;;  %s5918_s9 = inlined_call_operand.vmem [shape: f32[1,64], index: 9, kind: input, shape index: {}]   ;;  %s5919_s10 = inlined_call_operand.<no memory space> [shape: f32[1,1], index: 10, kind: input, shape index: {}]   ;;  %s5920_s11 = inlined_call_operand.hbm [shape: f32[1,1,1], index: 11, kind: output, shape index: {}]  }
   0x1   :  { %v16_v0 = vstv %s5919_s10 }
   0x2   :  { %17 = vst [vmem:[#allocation2] sm:$0x1] %v16_v0 }
   0x3   :  { %v42_v1 = vld [vmem:[%s5910_s1] sm:$0x1f]  ;;  %vm52_vm0 = vcmask 1044480   ;;  %v4994_v3 = vmov 0.0   ;;  %vm4995_vm1 = vmmov 0   ;;  %vm48_vm2 = vcmask 39936  }
   0x4   :  { %v41_v2 = vld [vmem:[%s5909_s0] sm:$0xff]  ;;  %4512 = vmatprep.subr.mxu0 %v4994_v3  ;;  %4514 = vmatprep.mubr.msk.f32.mxu0 %vm4995_vm1, %v4994_v3  ;;  %v137_v4 = vld [vmem:[%s5911_s2 + $0x18] sm:$0xff]  ;;  %v136_v6 = vld [vmem:[%s5911_s2 + $0x10] sm:$0xff] }
   0x5   :  { %v141_v5 = vld [vmem:[%s5911_s2 + $0x38] sm:$0xff]  ;;  %4513 = vmatpush3.msk.msra.mxu0 %vm52_vm0, %v42_v1  ;;  %4517 = vmatprep.subr.mxu1 %v4994_v3  ;;  %v140_v7 = vld [vmem:[%s5911_s2 + $0x30] sm:$0xff] }
   0x6   :  { %4515 = vmatmul.mubr.msk.f32.vlgmr.msra.gmra.mxu0 %vm48_vm2, %v41_v2  ;;  %4528 = vmatprep.subr.mxu0 %v4994_v3 }
   0x7   :  { %18 = vsyncpa [#allocation4], 0  ;;  %4518 = vmatpush3.msra.mxu1 %v137_v4  ;;  %4529 = vmatpush3.msra.mxu0 %v141_v5  ;;  %v135_v8 = vld [vmem:[%s5911_s2 + $0x8] sm:$0xff]  ;;  %v134_v10 = vld [vmem:[%s5911_s2] sm:$0xff]  ;;  %vm198_vm3 = vcmask 261120   ;;  %vm2012_vm4 = vcmask 31744  }
   0x8   :  { %4519 = vmatprep.subr.mxu1 %v4994_v3  ;;  %4530 = vmatprep.subr.mxu0 %v4994_v3  ;;  %v139_v9 = vld [vmem:[%s5911_s2 + $0x28] sm:$0xff]  ;;  %v138_v11 = vld [vmem:[%s5911_s2 + $0x20] sm:$0xff]  ;;  %v145_v15 = vld [vmem:[%s5911_s2 + $0x58] sm:$0xff]  ;;  %vm2621_vm5 = vcmask 64512   ;;  %vm3305_vm6 = vcmask 1043456   ;;  %vm4057_vm7 = vcmask 523264  }
   0x9   :  { %4520 = vmatpush3.msra.mxu1 %v136_v6  ;;  %4531 = vmatpush3.msra.mxu0 %v140_v7  ;;  %v4188_v12 = vld [vmem:[%s5916_s7] ss:$0 sm:$0xff]  ;;  %v149_v16 = vld [vmem:[%s5911_s2 + $0x78] sm:$0xff]  ;;  %v144_v18 = vld [vmem:[%s5911_s2 + $0x50] sm:$0xff]  ;;  %vm4172_vm8 = vcmask 0  }
   0xa   :  { %4521 = vmatprep.subr.mxu1 %v4994_v3  ;;  %4532 = vmatprep.subr.mxu0 %v4994_v3  ;;  %v148_v19 = vld [vmem:[%s5911_s2 + $0x70] sm:$0xff]  ;;  %v143_v20 = vld [vmem:[%s5911_s2 + $0x48] sm:$0xff]  ;;  %v142_v22 = vld [vmem:[%s5911_s2 + $0x40] sm:$0xff] }
   0xb   :  { %4522 = vmatpush3.msra.mxu1 %v135_v8  ;;  %4533 = vmatpush3.msra.mxu0 %v139_v9  ;;  %v147_v21 = vld [vmem:[%s5911_s2 + $0x68] sm:$0xff]  ;;  %v146_v23 = vld [vmem:[%s5911_s2 + $0x60] sm:$0xff]  ;;  %v153_v24 = vld [vmem:[%s5911_s2 + $0x98] sm:$0xff] }
   0xc   :  { %4523 = vmatprep.subr.mxu1 %v4994_v3  ;;  %4534 = vmatprep.subr.mxu0 %v4994_v3  ;;  %v157_v25 = vld [vmem:[%s5911_s2 + $0xb8] sm:$0xff]  ;;  %v152_v26 = vld [vmem:[%s5911_s2 + $0x90] sm:$0xff]  ;;  %v151_v28 = vld [vmem:[%s5911_s2 + $0x88] sm:$0xff] }
   0xd   :  { %4525 = vmatprep.mubr.msk.f32.mxu1 %vm4995_vm1, %v4994_v3  ;;  %4536 = vmatprep.mubr.msk.f32.mxu0 %vm4995_vm1, %v4994_v3  ;;  %v156_v27 = vld [vmem:[%s5911_s2 + $0xb0] sm:$0xff]  ;;  %v155_v29 = vld [vmem:[%s5911_s2 + $0xa8] sm:$0xff]  ;;  %v150_v30 = vld [vmem:[%s5911_s2 + $0x80] sm:$0xff] }
   0xe   :  { %4524 = vmatpush3.msra.mxu1 %v134_v10  ;;  %4535 = vmatpush3.msra.mxu0 %v138_v11  ;;  %v154_v31 = vld [vmem:[%s5911_s2 + $0xa0] sm:$0xff]  ;;  %v161_v32 = vld [vmem:[%s5911_s2 + $0xd8] sm:$0xff]  ;;  %v160_v34 = vld [vmem:[%s5911_s2 + $0xd0] sm:$0xff] }
   0xf   :  { %4539 = vmatprep.subr.mxu1 %v4994_v3  ;;  %4550 = vmatprep.subr.mxu0 %v4994_v3  ;;  %v165_v33 = vld [vmem:[%s5911_s2 + $0xf8] sm:$0xff]  ;;  %v164_v35 = vld [vmem:[%s5911_s2 + $0xf0] sm:$0xff]  ;;  %v159_v36 = vld [vmem:[%s5911_s2 + $0xc8] sm:$0xff] }
  0x10   :  { %v163_v37 = vld [vmem:[%s5911_s2 + $0xe8] sm:$0xff]  ;;  %v158_v38 = vld [vmem:[%s5911_s2 + $0xc0] sm:$0xff]  ;;  %v4202_v40 = vld [vmem:[%s5911_s2 + $0x118] sm:$0xff] }
  0x11   :  { %v162_v39 = vld [vmem:[%s5911_s2 + $0xe0] sm:$0xff]  ;;  %v4206_v41 = vld [vmem:[%s5911_s2 + $0x138] sm:$0xff]  ;;  %v4201_v42 = vld [vmem:[%s5911_s2 + $0x110] sm:$0xff] }
  0x12   :  { %v4205_v43 = vld [vmem:[%s5911_s2 + $0x130] sm:$0xff]  ;;  %v4200_v44 = vld [vmem:[%s5911_s2 + $0x108] sm:$0xff]  ;;  %v4199_v46 = vld [vmem:[%s5911_s2 + $0x100] sm:$0xff] }
  0x13   :  { %v4204_v45 = vld [vmem:[%s5911_s2 + $0x128] sm:$0xff]  ;;  %v4203_v47 = vld [vmem:[%s5911_s2 + $0x120] sm:$0xff]  ;;  %v4210_v48 = vld [vmem:[%s5911_s2 + $0x158] sm:$0xff] }
  0x14   :  { %v4214_v49 = vld [vmem:[%s5911_s2 + $0x178] sm:$0xff]  ;;  %v4209_v50 = vld [vmem:[%s5911_s2 + $0x150] sm:$0xff]  ;;  %v4208_v52 = vld [vmem:[%s5911_s2 + $0x148] sm:$0xff] }
  0x15   :  { %v4213_v51 = vld [vmem:[%s5911_s2 + $0x170] sm:$0xff]  ;;  %v4212_v53 = vld [vmem:[%s5911_s2 + $0x168] sm:$0xff]  ;;  %v4207_v54 = vld [vmem:[%s5911_s2 + $0x140] sm:$0xff] }
  0x16   :  { %v4211_v55 = vld [vmem:[%s5911_s2 + $0x160] sm:$0xff]  ;;  %v4218_v56 = vld [vmem:[%s5911_s2 + $0x198] sm:$0xff]  ;;  %v4217_v58 = vld [vmem:[%s5911_s2 + $0x190] sm:$0xff] }
  0x17   :  { %v4222_v57 = vld [vmem:[%s5911_s2 + $0x1b8] sm:$0xff]  ;;  %v4221_v59 = vld [vmem:[%s5911_s2 + $0x1b0] sm:$0xff]  ;;  %v4216_v60 = vld [vmem:[%s5911_s2 + $0x188] sm:$0xff] }
  0x18   :  { %v4220_v61 = vld [vmem:[%s5911_s2 + $0x1a8] sm:$0xff]  ;;  %v4215_v62 = vld [vmem:[%s5911_s2 + $0x180] sm:$0xff]  ;;  %v4226_v0 = vld [vmem:[%s5911_s2 + $0x1d8] sm:$0xff] }
  0x19   :  { %v4219_v63 = vld [vmem:[%s5911_s2 + $0x1a0] sm:$0xff]  ;;  %v4230_v1 = vld [vmem:[%s5911_s2 + $0x1f8] sm:$0xff]  ;;  %v4225_v2 = vld [vmem:[%s5911_s2 + $0x1d0] sm:$0xff] }
  0x1a   :  { %v4229_v4 = vld [vmem:[%s5911_s2 + $0x1f0] sm:$0xff]  ;;  %v4224_v5 = vld [vmem:[%s5911_s2 + $0x1c8] sm:$0xff]  ;;  %v4223_v7 = vld [vmem:[%s5911_s2 + $0x1c0] sm:$0xff] }
  0x1b   :  { %v4228_v6 = vld [vmem:[%s5911_s2 + $0x1e8] sm:$0xff]  ;;  %v4227_v8 = vld [vmem:[%s5911_s2 + $0x1e0] sm:$0xff]  ;;  %v4242_v9 = vld [vmem:[%s5911_s2 + $0x218] sm:$0xff] }
  0x1c   :  { %v4246_v10 = vld [vmem:[%s5911_s2 + $0x238] sm:$0xff]  ;;  %v4241_v11 = vld [vmem:[%s5911_s2 + $0x210] sm:$0xff] }
  0xc6   :  { %v122_v13 = vpop.f32.mrf.mxu0 }
  0xc7   :  { %v5110_v14 = vadd.f32 %v4188_v12, %v122_v13  ;;  %v4245_v12 = vld [vmem:[%s5911_s2 + $0x230] sm:$0xff]  ;;  %v4240_v13 = vld [vmem:[%s5911_s2 + $0x208] sm:$0xff] }
  0xc8   :  { %v4516_v17 = vpop.f32.mrf.mxu0 }
  0xc9   :  { %4526 = vmatmul.mubr.msk.f32.vlgmr.msra.gmra.mxu1 %vm198_vm3, %v5110_v14  ;;  %4537 = vmatmul.mubr.msk.f32.vlgmr.msra.gmra.mxu0 %vm198_vm3, %v5110_v14  ;;  %v4243_v17 = vld [vmem:[%s5911_s2 + $0x220] sm:$0xff] }
  0xca   :  { %4540 = vmatpush3.msra.mxu1 %v145_v15  ;;  %4551 = vmatpush3.msra.mxu0 %v149_v16  ;;  %v4244_v15 = vld [vmem:[%s5911_s2 + $0x228] sm:$0xff]  ;;  %v4239_v16 = vld [vmem:[%s5911_s2 + $0x200] sm:$0xff] }
  0xcb   :  { %4541 = vmatprep.subr.mxu1 %v4994_v3  ;;  %4552 = vmatprep.subr.mxu0 %v4994_v3 }
  0xcc   :  { %4542 = vmatpush3.msra.mxu1 %v144_v18  ;;  %4553 = vmatpush3.msra.mxu0 %v148_v19  ;;  %v4250_v18 = vld [vmem:[%s5911_s2 + $0x258] sm:$0xff] }
  0xcd   :  { %4543 = vmatprep.subr.mxu1 %v4994_v3  ;;  %4554 = vmatprep.subr.mxu0 %v4994_v3  ;;  %v4254_v19 = vld [vmem:[%s5911_s2 + $0x278] sm:$0xff] }
  0xce   :  { %4544 = vmatpush3.msra.mxu1 %v143_v20  ;;  %4555 = vmatpush3.msra.mxu0 %v147_v21  ;;  %v4249_v20 = vld [vmem:[%s5911_s2 + $0x250] sm:$0xff] }
  0xcf   :  { %4545 = vmatprep.subr.mxu1 %v4994_v3  ;;  %4556 = vmatprep.subr.mxu0 %v4994_v3  ;;  %v4253_v21 = vld [vmem:[%s5911_s2 + $0x270] sm:$0xff] }
  0xd0   :  { %4546 = vmatpush3.msra.mxu1 %v142_v22  ;;  %4547 = vmatprep.mubr.msk.f32.mxu1 %vm4995_vm1, %v4994_v3  ;;  %v4248_v22 = vld [vmem:[%s5911_s2 + $0x248] sm:$0xff] }
  0xd1   :  { %4557 = vmatpush3.msra.mxu0 %v146_v23  ;;  %4558 = vmatprep.mubr.msk.f32.mxu0 %vm4995_vm1, %v4994_v3  ;;  %v4252_v23 = vld [vmem:[%s5911_s2 + $0x268] sm:$0xff] }
  0xd2   :  { %4548 = vmatmul.mubr.msk.f32.vlgmr.msra.gmra.mxu1 %vm198_vm3, %v5110_v14  ;;  %4559 = vmatmul.mubr.msk.f32.vlgmr.msra.gmra.mxu0 %vm198_vm3, %v5110_v14 }
  0xd3   :  { %4561 = vmatprep.subr.mxu1 %v4994_v3  ;;  %4572 = vmatprep.subr.mxu0 %v4994_v3 }
  0xd4   :  { %4562 = vmatpush3.msra.mxu1 %v153_v24  ;;  %4573 = vmatpush3.msra.mxu0 %v157_v25  ;;  %v4247_v24 = vld [vmem:[%s5911_s2 + $0x240] sm:$0xff] }
  0xd5   :  { %4563 = vmatprep.subr.mxu1 %v4994_v3  ;;  %4574 = vmatprep.subr.mxu0 %v4994_v3  ;;  %v4251_v25 = vld [vmem:[%s5911_s2 + $0x260] sm:$0xff] }
  0xd6   :  { %4564 = vmatpush3.msra.mxu1 %v152_v26  ;;  %4575 = vmatpush3.msra.mxu0 %v156_v27  ;;  %v4258_v26 = vld [vmem:[%s5911_s2 + $0x298] sm:$0xff] }
  0xd7   :  { %4565 = vmatprep.subr.mxu1 %v4994_v3  ;;  %4576 = vmatprep.subr.mxu0 %v4994_v3  ;;  %v4262_v27 = vld [vmem:[%s5911_s2 + $0x2b8] sm:$0xff] }
  0xd8   :  { %4566 = vmatpush3.msra.mxu1 %v151_v28  ;;  %4577 = vmatpush3.msra.mxu0 %v155_v29  ;;  %v4257_v28 = vld [vmem:[%s5911_s2 + $0x290] sm:$0xff] }
  0xd9   :  { %4567 = vmatprep.subr.mxu1 %v4994_v3  ;;  %4578 = vmatprep.subr.mxu0 %v4994_v3  ;;  %v4261_v29 = vld [vmem:[%s5911_s2 + $0x2b0] sm:$0xff] }
  0xda   :  { %4568 = vmatpush3.msra.mxu1 %v150_v30  ;;  %4569 = vmatprep.mubr.msk.f32.mxu1 %vm4995_vm1, %v4994_v3  ;;  %v4256_v30 = vld [vmem:[%s5911_s2 + $0x288] sm:$0xff] }
  0xdb   :  { %4579 = vmatpush3.msra.mxu0 %v154_v31  ;;  %4580 = vmatprep.mubr.msk.f32.mxu0 %vm4995_vm1, %v4994_v3  ;;  %v4260_v31 = vld [vmem:[%s5911_s2 + $0x2a8] sm:$0xff] }
  0xdc   :  { %4570 = vmatmul.mubr.msk.f32.vlgmr.msra.gmra.mxu1 %vm198_vm3, %v5110_v14  ;;  %4581 = vmatmul.mubr.msk.f32.vlgmr.msra.gmra.mxu0 %vm198_vm3, %v5110_v14 }
  0xdd   :  { %4583 = vmatprep.subr.mxu1 %v4994_v3  ;;  %4594 = vmatprep.subr.mxu0 %v4994_v3 }
  0xde   :  { %4584 = vmatpush3.msra.mxu1 %v161_v32  ;;  %4595 = vmatpush3.msra.mxu0 %v165_v33  ;;  %v4255_v32 = vld [vmem:[%s5911_s2 + $0x280] sm:$0xff] }
  0xdf   :  { %4585 = vmatprep.subr.mxu1 %v4994_v3  ;;  %4596 = vmatprep.subr.mxu0 %v4994_v3  ;;  %v4259_v33 = vld [vmem:[%s5911_s2 + $0x2a0] sm:$0xff] }
  0xe0   :  { %4586 = vmatpush3.msra.mxu1 %v160_v34  ;;  %4597 = vmatpush3.msra.mxu0 %v164_v35  ;;  %v4266_v34 = vld [vmem:[%s5911_s2 + $0x2d8] sm:$0xff] }
  0xe1   :  { %4587 = vmatprep.subr.mxu1 %v4994_v3  ;;  %4598 = vmatprep.subr.mxu0 %v4994_v3  ;;  %v4270_v35 = vld [vmem:[%s5911_s2 + $0x2f8] sm:$0xff] }
  0xe2   :  { %4588 = vmatpush3.msra.mxu1 %v159_v36  ;;  %4599 = vmatpush3.msra.mxu0 %v163_v37  ;;  %v4265_v36 = vld [vmem:[%s5911_s2 + $0x2d0] sm:$0xff] }
  0xe3   :  { %4589 = vmatprep.subr.mxu1 %v4994_v3  ;;  %4600 = vmatprep.subr.mxu0 %v4994_v3  ;;  %v4269_v37 = vld [vmem:[%s5911_s2 + $0x2f0] sm:$0xff] }
  0xe4   :  { %4590 = vmatpush3.msra.mxu1 %v158_v38  ;;  %4591 = vmatprep.mubr.msk.f32.mxu1 %vm4995_vm1, %v4994_v3  ;;  %v4264_v38 = vld [vmem:[%s5911_s2 + $0x2c8] sm:$0xff] }
  0xe5   :  { %4601 = vmatpush3.msra.mxu0 %v162_v39  ;;  %4602 = vmatprep.mubr.msk.f32.mxu0 %vm4995_vm1, %v4994_v3  ;;  %v4268_v39 = vld [vmem:[%s5911_s2 + $0x2e8] sm:$0xff] }
  0xe6   :  { %4592 = vmatmul.mubr.msk.f32.vlgmr.msra.gmra.mxu1 %vm198_vm3, %v5110_v14  ;;  %4603 = vmatmul.mubr.msk.f32.vlgmr.msra.gmra.mxu0 %vm198_vm3, %v5110_v14 }
  0xe7   :  { %4605 = vmatprep.subr.mxu1 %v4994_v3  ;;  %4616 = vmatprep.subr.mxu0 %v4994_v3 }
  0xe8   :  { %4606 = vmatpush3.msra.mxu1 %v4202_v40  ;;  %4617 = vmatpush3.msra.mxu0 %v4206_v41  ;;  %v4263_v40 = vld [vmem:[%s5911_s2 + $0x2c0] sm:$0xff] }
  0xe9   :  { %4607 = vmatprep.subr.mxu1 %v4994_v3  ;;  %4618 = vmatprep.subr.mxu0 %v4994_v3  ;;  %v4267_v41 = vld [vmem:[%s5911_s2 + $0x2e0] sm:$0xff] }
  0xea   :  { %4608 = vmatpush3.msra.mxu1 %v4201_v42  ;;  %4619 = vmatpush3.msra.mxu0 %v4205_v43 }
  0xeb   :  { %4609 = vmatprep.subr.mxu1 %v4994_v3  ;;  %4620 = vmatprep.subr.mxu0 %v4994_v3 }
  0xec   :  { %4610 = vmatpush3.msra.mxu1 %v4200_v44  ;;  %4621 = vmatpush3.msra.mxu0 %v4204_v45 }
  0xed   :  { %4611 = vmatprep.subr.mxu1 %v4994_v3  ;;  %4622 = vmatprep.subr.mxu0 %v4994_v3 }
  0xee   :  { %4612 = vmatpush3.msra.mxu1 %v4199_v46  ;;  %4613 = vmatprep.mubr.msk.f32.mxu1 %vm4995_vm1, %v4994_v3 }
  0xef   :  { %4623 = vmatpush3.msra.mxu0 %v4203_v47  ;;  %4624 = vmatprep.mubr.msk.f32.mxu0 %vm4995_vm1, %v4994_v3 }
  0xf0   :  { %4614 = vmatmul.mubr.msk.f32.vlgmr.msra.gmra.mxu1 %vm198_vm3, %v5110_v14  ;;  %4625 = vmatmul.mubr.msk.f32.vlgmr.msra.gmra.mxu0 %vm198_vm3, %v5110_v14 }
  0xf1   :  { %4627 = vmatprep.subr.mxu1 %v4994_v3  ;;  %4638 = vmatprep.subr.mxu0 %v4994_v3 }
  0xf2   :  { %4628 = vmatpush3.msra.mxu1 %v4210_v48  ;;  %4639 = vmatpush3.msra.mxu0 %v4214_v49 }
  0xf3   :  { %4629 = vmatprep.subr.mxu1 %v4994_v3  ;;  %4640 = vmatprep.subr.mxu0 %v4994_v3 }
  0xf4   :  { %4630 = vmatpush3.msra.mxu1 %v4209_v50  ;;  %4641 = vmatpush3.msra.mxu0 %v4213_v51 }
  0xf5   :  { %4631 = vmatprep.subr.mxu1 %v4994_v3  ;;  %4642 = vmatprep.subr.mxu0 %v4994_v3 }
  0xf6   :  { %4632 = vmatpush3.msra.mxu1 %v4208_v52  ;;  %4643 = vmatpush3.msra.mxu0 %v4212_v53 }
  0xf7   :  { %4633 = vmatprep.subr.mxu1 %v4994_v3  ;;  %4644 = vmatprep.subr.mxu0 %v4994_v3 }
  0xf8   :  { %4634 = vmatpush3.msra.mxu1 %v4207_v54  ;;  %4635 = vmatprep.mubr.msk.f32.mxu1 %vm4995_vm1, %v4994_v3  ;;  %v166_v54 = vlaneseq }
  0xf9   :  { %4645 = vmatpush3.msra.mxu0 %v4211_v55  ;;  %4646 = vmatprep.mubr.msk.f32.mxu0 %vm4995_vm1, %v4994_v3 }
  0xfa   :  { %4636 = vmatmul.mubr.msk.f32.vlgmr.msra.gmra.mxu1 %vm198_vm3, %v5110_v14  ;;  %4647 = vmatmul.mubr.msk.f32.vlgmr.msra.gmra.mxu0 %vm198_vm3, %v5110_v14 }
  0xfb   :  { %4649 = vmatprep.subr.mxu1 %v4994_v3  ;;  %4660 = vmatprep.subr.mxu0 %v4994_v3 }
  0xfc   :  { %4650 = vmatpush3.msra.mxu1 %v4218_v56  ;;  %4661 = vmatpush3.msra.mxu0 %v4222_v57  ;;  %v5568_v57 = vshrl.u32 %v166_v54, 7 }
  0xfd   :  { %4651 = vmatprep.subr.mxu1 %v4994_v3  ;;  %4662 = vmatprep.subr.mxu0 %v4994_v3 }
  0xfe   :  { %4652 = vmatpush3.msra.mxu1 %v4217_v58  ;;  %4663 = vmatpush3.msra.mxu0 %v4221_v59  ;;  %v1422_v54 = vsub.s32 2, %v5568_v57 }
  0xff   :  { %4653 = vmatprep.subr.mxu1 %v4994_v3  ;;  %4664 = vmatprep.subr.mxu0 %v4994_v3 }
 0x100   :  { %4654 = vmatpush3.msra.mxu1 %v4216_v60  ;;  %4665 = vmatpush3.msra.mxu0 %v4220_v61  ;;  %v5571_v60 = vsub.s32 1, %v5568_v57  ;;  %v5576_v61 = vld [vmem:[%s5917_s8] sm:$0x7] }
 0x101   :  { %4655 = vmatprep.subr.mxu1 %v4994_v3  ;;  %4666 = vmatprep.subr.mxu0 %v4994_v3 }
 0x102   :  { %4656 = vmatpush3.msra.mxu1 %v4215_v62  ;;  %4657 = vmatprep.mubr.msk.f32.mxu1 %vm4995_vm1, %v4994_v3  ;;  %v5579_v62 = vsub.s32 0, %v5568_v57 }
 0x103   :  { %4667 = vmatpush3.msra.mxu0 %v4219_v63  ;;  %4668 = vmatprep.mubr.msk.f32.mxu0 %vm4995_vm1, %v4994_v3  ;;  %v798_v63 = vrot.slane %v5576_v61, %v5571_v60 }
 0x104   :  { %4658 = vmatmul.mubr.msk.f32.vlgmr.msra.gmra.mxu1 %vm198_vm3, %v5110_v14  ;;  %4669 = vmatmul.mubr.msk.f32.vlgmr.msra.gmra.mxu0 %vm198_vm3, %v5110_v14 }
 0x105   :  { %4671 = vmatprep.subr.mxu1 %v4994_v3  ;;  %4682 = vmatprep.subr.mxu0 %v4994_v3 }
 0x106   :  { %4672 = vmatpush3.msra.mxu1 %v4226_v0  ;;  %4683 = vmatpush3.msra.mxu0 %v4230_v1  ;;  %v169_v0 = vrot.slane %v5576_v61, %v5579_v62  ;;  %v5588_v1 = vld [vmem:[%s5917_s8 + $0x4] sm:$0x7] }
 0x107   :  { %4673 = vmatprep.subr.mxu1 %v4994_v3  ;;  %4684 = vmatprep.subr.mxu0 %v4994_v3 }
 0x108   :  { %4674 = vmatpush3.msra.mxu1 %v4225_v2  ;;  %4685 = vmatpush3.msra.mxu0 %v4229_v4 }
 0x109   :  { %4675 = vmatprep.subr.mxu1 %v4994_v3  ;;  %4686 = vmatprep.subr.mxu0 %v4994_v3 }
 0x10a   :  { %4676 = vmatpush3.msra.mxu1 %v4224_v5  ;;  %4687 = vmatpush3.msra.mxu0 %v4228_v6  ;;  %v802_v6 = vrot.slane %v5588_v1, %v5571_v60 }
 0x10b   :  { %4677 = vmatprep.subr.mxu1 %v4994_v3  ;;  %4688 = vmatprep.subr.mxu0 %v4994_v3 }
 0x10c   :  { %4678 = vmatpush3.msra.mxu1 %v4223_v7  ;;  %4679 = vmatprep.mubr.msk.f32.mxu1 %vm4995_vm1, %v4994_v3 }
 0x10d   :  { %4689 = vmatpush3.msra.mxu0 %v4227_v8  ;;  %4690 = vmatprep.mubr.msk.f32.mxu0 %vm4995_vm1, %v4994_v3 }
 0x10e   :  { %4680 = vmatmul.mubr.msk.f32.vlgmr.msra.gmra.mxu1 %vm198_vm3, %v5110_v14  ;;  %4691 = vmatmul.mubr.msk.f32.vlgmr.msra.gmra.mxu0 %vm198_vm3, %v5110_v14 }
 0x10f   :  { %4693 = vmatprep.subr.mxu1 %v4994_v3  ;;  %4704 = vmatprep.subr.mxu0 %v4994_v3 }
 0x110   :  { %4694 = vmatpush3.msra.mxu1 %v4242_v9  ;;  %4705 = vmatpush3.msra.mxu0 %v4246_v10  ;;  %v173_v10 = vrot.slane %v5588_v1, %v5579_v62 }
 0x111   :  { %4695 = vmatprep.subr.mxu1 %v4994_v3  ;;  %4706 = vmatprep.subr.mxu0 %v4994_v3 }
 0x112   :  { %4696 = vmatpush3.msra.mxu1 %v4241_v11  ;;  %4707 = vmatpush3.msra.mxu0 %v4245_v12  ;;  %v5599_v12 = vld [vmem:[%s5917_s8 + $0x8] sm:$0x7] }
 0x113   :  { %4697 = vmatprep.subr.mxu1 %v4994_v3  ;;  %4708 = vmatprep.subr.mxu0 %v4994_v3 }
 0x114   :  { %4698 = vmatpush3.msra.mxu1 %v4240_v13  ;;  %4709 = vmatpush3.msra.mxu0 %v4244_v15  ;;  %v5604_v13 = vld [vmem:[%s5917_s8 + $0xc] sm:$0x7]  ;;  %v806_v15 = vrot.slane %v5599_v12, %v5571_v60 }
 0x115   :  { %4699 = vmatprep.subr.mxu1 %v4994_v3  ;;  %4710 = vmatprep.subr.mxu0 %v4994_v3 }
 0x116   :  { %4700 = vmatpush3.msra.mxu1 %v4239_v16  ;;  %4701 = vmatprep.mubr.msk.f32.mxu1 %vm4995_vm1, %v4994_v3  ;;  %v810_v16 = vrot.slane %v5604_v13, %v5571_v60 }
 0x117   :  { %4711 = vmatpush3.msra.mxu0 %v4243_v17  ;;  %4712 = vmatprep.mubr.msk.f32.mxu0 %vm4995_vm1, %v4994_v3 }
 0x118   :  { %4702 = vmatmul.mubr.msk.f32.vlgmr.msra.gmra.mxu1 %vm198_vm3, %v5110_v14  ;;  %4713 = vmatmul.mubr.msk.f32.vlgmr.msra.gmra.mxu0 %vm198_vm3, %v5110_v14 }
 0x119   :  { %4715 = vmatprep.subr.mxu1 %v4994_v3  ;;  %4726 = vmatprep.subr.mxu0 %v4994_v3 }
 0x11a   :  { %4716 = vmatpush3.msra.mxu1 %v4250_v18  ;;  %4727 = vmatpush3.msra.mxu0 %v4254_v19  ;;  %v177_v18 = vrot.slane %v5599_v12, %v5579_v62  ;;  %v181_v19 = vrot.slane %v5604_v13, %v5579_v62 }
 0x11b   :  { %4717 = vmatprep.subr.mxu1 %v4994_v3  ;;  %4728 = vmatprep.subr.mxu0 %v4994_v3 }
 0x11c   :  { %4718 = vmatpush3.msra.mxu1 %v4249_v20  ;;  %4729 = vmatpush3.msra.mxu0 %v4253_v21 }
 0x11d   :  { %4719 = vmatprep.subr.mxu1 %v4994_v3  ;;  %4730 = vmatprep.subr.mxu0 %v4994_v3 }
 0x11e   :  { %4720 = vmatpush3.msra.mxu1 %v4248_v22  ;;  %4731 = vmatpush3.msra.mxu0 %v4252_v23 }
 0x11f   :  { %4721 = vmatprep.subr.mxu1 %v4994_v3  ;;  %4732 = vmatprep.subr.mxu0 %v4994_v3 }
 0x120   :  { %4722 = vmatpush3.msra.mxu1 %v4247_v24  ;;  %4723 = vmatprep.mubr.msk.f32.mxu1 %vm4995_vm1, %v4994_v3 }
 0x121   :  { %4733 = vmatpush3.msra.mxu0 %v4251_v25  ;;  %4734 = vmatprep.mubr.msk.f32.mxu0 %vm4995_vm1, %v4994_v3 }
 0x122   :  { %4724 = vmatmul.mubr.msk.f32.vlgmr.msra.gmra.mxu1 %vm198_vm3, %v5110_v14  ;;  %4735 = vmatmul.mubr.msk.f32.vlgmr.msra.gmra.mxu0 %vm198_vm3, %v5110_v14 }
 0x123   :  { %4737 = vmatprep.subr.mxu1 %v4994_v3  ;;  %4748 = vmatprep.subr.mxu0 %v4994_v3 }
 0x124   :  { %4738 = vmatpush3.msra.mxu1 %v4258_v26  ;;  %4749 = vmatpush3.msra.mxu0 %v4262_v27 }
 0x125   :  { %4739 = vmatprep.subr.mxu1 %v4994_v3  ;;  %4750 = vmatprep.subr.mxu0 %v4994_v3 }
 0x126   :  { %4740 = vmatpush3.msra.mxu1 %v4257_v28  ;;  %4751 = vmatpush3.msra.mxu0 %v4261_v29  ;;  %v5629_v28 = vld [vmem:[%s5917_s8 + $0x10] sm:$0x7]  ;;  %v5634_v29 = vld [vmem:[%s5917_s8 + $0x14] sm:$0x7] }
 0x127   :  { %4741 = vmatprep.subr.mxu1 %v4994_v3  ;;  %4752 = vmatprep.subr.mxu0 %v4994_v3 }
 0x128   :  { %4742 = vmatpush3.msra.mxu1 %v4256_v30  ;;  %4753 = vmatpush3.msra.mxu0 %v4260_v31  ;;  %v814_v30 = vrot.slane %v5629_v28, %v5571_v60  ;;  %v818_v31 = vrot.slane %v5634_v29, %v5571_v60 }
 0x129   :  { %4743 = vmatprep.subr.mxu1 %v4994_v3  ;;  %4754 = vmatprep.subr.mxu0 %v4994_v3 }
 0x12a   :  { %4744 = vmatpush3.msra.mxu1 %v4255_v32  ;;  %4745 = vmatprep.mubr.msk.f32.mxu1 %vm4995_vm1, %v4994_v3  ;;  %v185_v32 = vrot.slane %v5629_v28, %v5579_v62 }
 0x12b   :  { %4755 = vmatpush3.msra.mxu0 %v4259_v33  ;;  %4756 = vmatprep.mubr.msk.f32.mxu0 %vm4995_vm1, %v4994_v3  ;;  %v189_v33 = vrot.slane %v5634_v29, %v5579_v62 }
 0x12c   :  { %4746 = vmatmul.mubr.msk.f32.vlgmr.msra.gmra.mxu1 %vm198_vm3, %v5110_v14  ;;  %4757 = vmatmul.mubr.msk.f32.vlgmr.msra.gmra.mxu0 %vm198_vm3, %v5110_v14 }
 0x12d   :  { %4759 = vmatprep.subr.mxu1 %v4994_v3  ;;  %4770 = vmatprep.subr.mxu0 %v4994_v3 }
 0x12e   :  { %4760 = vmatpush3.msra.mxu1 %v4266_v34  ;;  %4771 = vmatpush3.msra.mxu0 %v4270_v35 }
 0x12f   :  { %4761 = vmatprep.subr.mxu1 %v4994_v3  ;;  %4772 = vmatprep.subr.mxu0 %v4994_v3 }
 0x130   :  { %4762 = vmatpush3.msra.mxu1 %v4265_v36  ;;  %4773 = vmatpush3.msra.mxu0 %v4269_v37 }
 0x131   :  { %4763 = vmatprep.subr.mxu1 %v4994_v3  ;;  %4774 = vmatprep.subr.mxu0 %v4994_v3 }
 0x132   :  { %4764 = vmatpush3.msra.mxu1 %v4264_v38  ;;  %4775 = vmatpush3.msra.mxu0 %v4268_v39 }
 0x133   :  { %4765 = vmatprep.subr.mxu1 %v4994_v3  ;;  %4776 = vmatprep.subr.mxu0 %v4994_v3 }
 0x134   :  { %4766 = vmatpush3.msra.mxu1 %v4263_v40  ;;  %4767 = vmatprep.mubr.msk.f32.mxu1 %vm4995_vm1, %v4994_v3 }
 0x135   :  { %4777 = vmatpush3.msra.mxu0 %v4267_v41  ;;  %4778 = vmatprep.mubr.msk.f32.mxu0 %vm4995_vm1, %v4994_v3 }
 0x136   :  { %4768 = vmatmul.mubr.msk.f32.vlgmr.msra.gmra.mxu1 %vm198_vm3, %v5110_v14  ;;  %4779 = vmatmul.mubr.msk.f32.vlgmr.msra.gmra.mxu0 %vm198_vm3, %v5110_v14 }
 0x137   :  { %4781 = vmatprep.subr.mxu1 %v4994_v3  ;;  %4783 = vmatprep.mubr.msk.f32.mxu1 %vm4995_vm1, %v4994_v3 }
 0x138   :  { %4796 = vmatprep.subr.mxu0 %v4994_v3  ;;  %4798 = vmatprep.mubr.msk.f32.mxu0 %vm4995_vm1, %v4994_v3 }
 0x189   :  { %v268_v42 = vpop.f32.mrf.mxu1  ;;  %v338_v43 = vpop.f32.mrf.mxu0 }
 0x18a   :  { %v269_v9 = vadd.f32 %v268_v42, %v169_v0  ;;  %v339_v17 = vadd.f32 %v338_v43, %v173_v10  ;;  %v132_v42 = vld [vmem:[%s5917_s8 + $0x18] sm:$0x7]  ;;  %v133_v43 = vld [vmem:[%s5917_s8 + $0x1c] sm:$0x7]  ;;  %v1439_v10 = vrot.slane %v5629_v28, %v1422_v54 }
 0x18b   :  { %v4527_v44 = vpop.f32.mrf.mxu1  ;;  %v4538_v45 = vpop.f32.mrf.mxu0 }
 0x18c   :  { %v822_v44 = vrot.slane %v132_v42, %v5571_v60  ;;  %v826_v45 = vrot.slane %v133_v43, %v5571_v60  ;;  %v1423_v60 = vrot.slane %v5576_v61, %v1422_v54  ;;  %v1431_v61 = vrot.slane %v5599_v12, %v1422_v54 }
 0x192   :  { %v408_v46 = vpop.f32.mrf.mxu1  ;;  %v478_v47 = vpop.f32.mrf.mxu0 }
 0x193   :  { %v409_v26 = vadd.f32 %v408_v46, %v177_v18  ;;  %v479_v27 = vadd.f32 %v478_v47, %v181_v19  ;;  %v193_v46 = vrot.slane %v132_v42, %v5579_v62  ;;  %v197_v47 = vrot.slane %v133_v43, %v5579_v62 }
 0x194   :  { %v4549_v48 = vpop.f32.mrf.mxu1  ;;  %v4560_v49 = vpop.f32.mrf.mxu0  ;;  %v1427_v62 = vrot.slane %v5588_v1, %v1422_v54  ;;  %v1435_v1 = vrot.slane %v5604_v13, %v1422_v54  ;;  %v1447_v19 = vrot.slane %v132_v42, %v1422_v54 }
 0x19c   :  { %v5560_v50 = vpop.f32.mrf.mxu1  ;;  %v5562_v51 = vpop.f32.mrf.mxu0 }
 0x19d   :  { %v549_v40 = vadd.f32 %v5560_v50, %v185_v32  ;;  %v619_v41 = vadd.f32 %v5562_v51, %v189_v33 }
 0x19e   :  { %v4571_v52 = vpop.f32.mrf.mxu1  ;;  %v4582_v53 = vpop.f32.mrf.mxu0 }
 0x1a6   :  { %v5564_v55 = vpop.f32.mrf.mxu1  ;;  %v5566_v56 = vpop.f32.mrf.mxu0 }
 0x1a8   :  { %v4593_v58 = vpop.f32.mrf.mxu1  ;;  %v4604_v59 = vpop.f32.mrf.mxu0 }
 0x1a9   :  { %v689_v58 = vadd.f32 %v5564_v55, %v193_v46  ;;  %v759_v59 = vadd.f32 %v5566_v56, %v197_v47 }
 0x1b0   :  { %v893_v2 = vpop.f32.mrf.mxu1  ;;  %v963_v4 = vpop.f32.mrf.mxu0 }
 0x1b1   :  { %v894_v5 = vadd.f32 %v893_v2, %v798_v63  ;;  %v964_v11 = vadd.f32 %v963_v4, %v802_v6 }
 0x1b2   :  { %v4615_v7 = vpop.f32.mrf.mxu1  ;;  %v4626_v8 = vpop.f32.mrf.mxu0 }
 0x1b3   :  { %4782 = vmatpush3.xpose.msk.msra.mxu1 %vm2012_vm4, %v894_v5 }
 0x1b4   :  { %4786 = vmatprep.subr.mxu1 %v4994_v3 }
 0x1b6   :  { %4784 = vmatmul.mubr.msk.f32.vlgmr.msra.gmra.mxu1 %vm2012_vm4, %v269_v9 }
 0x1b7   :  { %4787 = vmatpush3.xpose.msk.msra.mxu1 %vm2012_vm4, %v964_v11  ;;  %4788 = vmatprep.mubr.msk.f32.mxu1 %vm4995_vm1, %v4994_v3  ;;  %v1443_v11 = vrot.slane %v5634_v29, %v1422_v54 }
 0x1b8   :  { %4791 = vmatprep.subr.mxu1 %v4994_v3 }
 0x1ba   :  { %v1033_v20 = vpop.f32.mrf.mxu1  ;;  %v1103_v21 = vpop.f32.mrf.mxu0  ;;  %4789 = vmatmul.mubr.msk.f32.vlgmr.msra.gmra.mxu1 %vm2012_vm4, %v339_v17 }
 0x1bb   :  { %v1034_v22 = vadd.f32 %v1033_v20, %v806_v15  ;;  %v1104_v23 = vadd.f32 %v1103_v21, %v810_v16  ;;  %4793 = vmatprep.mubr.msk.f32.mxu1 %vm4995_vm1, %v4994_v3  ;;  %v1451_v20 = vrot.slane %v133_v43, %v1422_v54 }
 0x1bc   :  { %v4637_v24 = vpop.f32.mrf.mxu1  ;;  %v4648_v25 = vpop.f32.mrf.mxu0 }
 0x1bd   :  { %4792 = vmatpush3.xpose.msk.msra.mxu1 %vm2012_vm4, %v1034_v22  ;;  %4797 = vmatpush3.xpose.msk.msra.mxu0 %vm2012_vm4, %v1104_v23 }
 0x1be   :  { %4801 = vmatprep.subr.mxu1 %v4994_v3  ;;  %4806 = vmatprep.subr.mxu0 %v4994_v3 }
 0x1c0   :  { %4794 = vmatmul.mubr.msk.f32.vlgmr.msra.gmra.mxu1 %vm2012_vm4, %v409_v26  ;;  %4799 = vmatmul.mubr.msk.f32.vlgmr.msra.gmra.mxu0 %vm2012_vm4, %v479_v27 }
 0x1c1   :  { %4803 = vmatprep.mubr.msk.f32.mxu1 %vm4995_vm1, %v4994_v3  ;;  %4808 = vmatprep.mubr.msk.f32.mxu0 %vm4995_vm1, %v4994_v3 }
 0x1c4   :  { %v1173_v34 = vpop.f32.mrf.mxu1  ;;  %v1243_v35 = vpop.f32.mrf.mxu0 }
 0x1c5   :  { %v1174_v36 = vadd.f32 %v1173_v34, %v814_v30  ;;  %v1244_v37 = vadd.f32 %v1243_v35, %v818_v31 }
 0x1c6   :  { %v4659_v38 = vpop.f32.mrf.mxu1  ;;  %v4670_v39 = vpop.f32.mrf.mxu0 }
 0x1c7   :  { %4802 = vmatpush3.xpose.msk.msra.mxu1 %vm2012_vm4, %v1174_v36  ;;  %4807 = vmatpush3.xpose.msk.msra.mxu0 %vm2012_vm4, %v1244_v37 }
 0x1c8   :  { %4811 = vmatprep.subr.mxu1 %v4994_v3  ;;  %4816 = vmatprep.subr.mxu0 %v4994_v3 }
 0x1ca   :  { %4804 = vmatmul.mubr.msk.f32.vlgmr.msra.gmra.mxu1 %vm2012_vm4, %v549_v40  ;;  %4809 = vmatmul.mubr.msk.f32.vlgmr.msra.gmra.mxu0 %vm2012_vm4, %v619_v41 }
 0x1cb   :  { %4813 = vmatprep.mubr.msk.f32.mxu1 %vm4995_vm1, %v4994_v3  ;;  %4818 = vmatprep.mubr.msk.f32.mxu0 %vm4995_vm1, %v4994_v3 }
 0x1ce   :  { %v1313_v48 = vpop.f32.mrf.mxu1  ;;  %v1383_v49 = vpop.f32.mrf.mxu0 }
 0x1cf   :  { %v1314_v50 = vadd.f32 %v1313_v48, %v822_v44  ;;  %v1384_v51 = vadd.f32 %v1383_v49, %v826_v45 }
 0x1d0   :  { %v4681_v52 = vpop.f32.mrf.mxu1  ;;  %v4692_v53 = vpop.f32.mrf.mxu0 }
 0x1d1   :  { %4812 = vmatpush3.xpose.msk.msra.mxu1 %vm2012_vm4, %v1314_v50  ;;  %4817 = vmatpush3.xpose.msk.msra.mxu0 %vm2012_vm4, %v1384_v51 }
 0x1d2   :  { %4821 = vmatprep.subr.mxu1 %v4994_v3  ;;  %4826 = vmatprep.subr.mxu0 %v4994_v3 }
 0x1d4   :  { %4814 = vmatmul.mubr.msk.f32.vlgmr.msra.gmra.mxu1 %vm2012_vm4, %v689_v58  ;;  %4819 = vmatmul.mubr.msk.f32.vlgmr.msra.gmra.mxu0 %vm2012_vm4, %v759_v59 }
 0x1d5   :  { %4823 = vmatprep.mubr.msk.f32.mxu1 %vm4995_vm1, %v4994_v3  ;;  %4828 = vmatprep.mubr.msk.f32.mxu0 %vm4995_vm1, %v4994_v3 }
 0x1d8   :  { %v1518_v55 = vpop.f32.mrf.mxu1  ;;  %v1588_v56 = vpop.f32.mrf.mxu0 }
 0x1d9   :  { %v1519_v57 = vadd.f32 %v1518_v55, %v1423_v60  ;;  %v1589_v63 = vadd.f32 %v1588_v56, %v1427_v62 }
 0x1da   :  { %v4703_v0 = vpop.f32.mrf.mxu1  ;;  %v4714_v2 = vpop.f32.mrf.mxu0 }
 0x1db   :  { %4822 = vmatpush3.msra.mxu1 %v1519_v57  ;;  %4827 = vmatpush3.msra.mxu0 %v1589_v63 }
 0x1dc   :  { %4831 = vmatprep.subr.mxu1 %v4994_v3  ;;  %4836 = vmatprep.subr.mxu0 %v4994_v3 }
 0x1e2   :  { %v1658_v4 = vpop.f32.mrf.mxu1  ;;  %v1728_v5 = vpop.f32.mrf.mxu0 }
 0x1e3   :  { %v5691_v6 = vadd.f32 %v1658_v4, %v1431_v61  ;;  %v5693_v7 = vadd.f32 %v1728_v5, %v1435_v1 }
 0x1e4   :  { %v4725_v8 = vpop.f32.mrf.mxu1  ;;  %v4736_v9 = vpop.f32.mrf.mxu0 }
 0x1ec   :  { %v1798_v15 = vpop.f32.mrf.mxu1  ;;  %v1868_v16 = vpop.f32.mrf.mxu0 }
 0x1ed   :  { %v5697_v17 = vadd.f32 %v1798_v15, %v1439_v10  ;;  %v5699_v18 = vadd.f32 %v1868_v16, %v1443_v11 }
 0x1ee   :  { %v4747_v12 = vpop.f32.mrf.mxu1  ;;  %v4758_v13 = vpop.f32.mrf.mxu0 }
 0x1f6   :  { %v1938_v21 = vpop.f32.mrf.mxu1  ;;  %v2008_v22 = vpop.f32.mrf.mxu0 }
 0x1f7   :  { %v5701_v23 = vadd.f32 %v1938_v21, %v1447_v19  ;;  %v5703_v24 = vadd.f32 %v2008_v22, %v1451_v20 }
 0x1f8   :  { %v4769_v25 = vpop.f32.mrf.mxu1  ;;  %v4780_v26 = vpop.f32.mrf.mxu0 }
 0x276   :  { %v2085_v27 = vpop.f32.mrf.mxu1 }
 0x277   :  { %v2622_v28 = vsel %vm2621_vm5, %v2085_v27, -inf }
 0x278   :  { %2623 = vmax.xlane.f32.xlu0 %v2622_v28  ;;  %v4785_v29 = vpop.f32.mrf.mxu1 }
 0x27a   :  { %v2161_v30 = vpop.f32.mrf.mxu1 }
 0x27b   :  { %v2625_v31 = vsel %vm2621_vm5, %v2161_v30, -inf }
 0x27c   :  { %2626 = vmax.xlane.f32.xlu0 %v2625_v31  ;;  %v4790_v32 = vpop.f32.mrf.mxu1 }
 0x280   :  { %v2237_v33 = vpop.f32.mrf.mxu1  ;;  %v2313_v34 = vpop.f32.mrf.mxu0 }
 0x281   :  { %v2628_v35 = vsel %vm2621_vm5, %v2237_v33, -inf  ;;  %v2631_v38 = vsel %vm2621_vm5, %v2313_v34, -inf }
 0x282   :  { %2629 = vmax.xlane.f32.xlu1 %v2628_v35  ;;  %v4795_v36 = vpop.f32.mrf.mxu1  ;;  %v4800_v37 = vpop.f32.mrf.mxu0 }
 0x286   :  { %2632 = vmax.xlane.f32.xlu1 %v2631_v38 }
 0x28a   :  { %v2389_v39 = vpop.f32.mrf.mxu1  ;;  %v2465_v40 = vpop.f32.mrf.mxu0 }
 0x28b   :  { %v2634_v41 = vsel %vm2621_vm5, %v2389_v39, -inf  ;;  %v2637_v42 = vsel %vm2621_vm5, %v2465_v40, -inf }
 0x28c   :  { %2635 = vmax.xlane.f32.xlu0 %v2634_v41  ;;  %v4805_v43 = vpop.f32.mrf.mxu1  ;;  %2638 = vmax.xlane.f32.xlu1 %v2637_v42  ;;  %v4810_v44 = vpop.f32.mrf.mxu0 }
 0x294   :  { %v2541_v45 = vpop.f32.mrf.mxu1  ;;  %v2617_v46 = vpop.f32.mrf.mxu0 }
 0x295   :  { %v2640_v47 = vsel %vm2621_vm5, %v2541_v45, -inf  ;;  %v2643_v48 = vsel %vm2621_vm5, %v2617_v46, -inf }
 0x296   :  { %2641 = vmax.xlane.f32.xlu0 %v2640_v47  ;;  %v4815_v49 = vpop.f32.mrf.mxu1  ;;  %2644 = vmax.xlane.f32.xlu1 %v2643_v48  ;;  %v4820_v50 = vpop.f32.mrf.mxu0 }
 0x301   :  { %v2624_v51 = vpop.xlane.xlu0 %2623 }
 0x302   :  { %v2646_v52 = vsub.f32 %v2085_v27, %v2624_v51 }
 0x304   :  { %v2654_v53 = vmul.f32 1.442695, %v2646_v52 }
 0x305   :  { %v2627_v54 = vpop.xlane.xlu0 %2626 }
 0x306   :  { %4936 = vpow2.f32 %v2654_v53  ;;  %v2647_v58 = vsub.f32 %v2161_v30, %v2627_v54 }
 0x308   :  { %v2656_v59 = vmul.f32 1.442695, %v2647_v58  ;;  %v3296_v58 = vld [vmem:[%s5912_s3 + $0x8] sm:$0xf] }
 0x30a   :  { %4938 = vpow2.f32 %v2656_v59 }
 0x30b   :  { %v2630_v60 = vpop.xlane.xlu1 %2629 }
 0x30c   :  { %v2648_v62 = vsub.f32 %v2237_v33, %v2630_v60 }
 0x30e   :  { %v2658_v55 = vmul.f32 1.442695, %v2648_v62  ;;  %v3297_v62 = vld [vmem:[%s5912_s3 + $0xc] sm:$0xf] }
 0x30f   :  { %v2633_v56 = vpop.xlane.xlu1 %2632 }
 0x310   :  { %4940 = vpow2.f32 %v2658_v55  ;;  %v2649_v57 = vsub.f32 %v2313_v34, %v2633_v56 }
 0x312   :  { %v2660_v63 = vmul.f32 1.442695, %v2649_v57  ;;  %v3298_v57 = vld [vmem:[%s5912_s3 + $0x10] sm:$0xf] }
 0x313   :  { %v4937_v0 = vpop.eup %4936 }
 0x314   :  { %4942 = vpow2.f32 %v2660_v63  ;;  %v2670_v2 = vsel %vm2621_vm5, %v4937_v0, 0.0 }
 0x315   :  { %v2636_v61 = vpop.xlane.xlu0 %2635  ;;  %v2639_v1 = vpop.xlane.xlu1 %2638  ;;  %2671 = vadd.xlane.f32.xlu0 %v2670_v2  ;;  %v3299_v2 = vld [vmem:[%s5912_s3 + $0x14] sm:$0xf] }
 0x316   :  { %v2650_v4 = vsub.f32 %v2389_v39, %v2636_v61  ;;  %v2651_v5 = vsub.f32 %v2465_v40, %v2639_v1 }
 0x317   :  { %v4939_v8 = vpop.eup %4938 }
 0x318   :  { %v2662_v9 = vmul.f32 1.442695, %v2650_v4  ;;  %v2664_v10 = vmul.f32 1.442695, %v2651_v5  ;;  %v2673_v11 = vsel %vm2621_vm5, %v4939_v8, 0.0 }
 0x319   :  { %2674 = vadd.xlane.f32.xlu1 %v2673_v11  ;;  %v3300_v4 = vld [vmem:[%s5912_s3 + $0x18] sm:$0xf] }
 0x31a   :  { %4944 = vpow2.f32 %v2662_v9 }
 0x31b   :  { %4946 = vpow2.f32 %v2664_v10 }
 0x31d   :  { %v4941_v15 = vpop.eup %4940 }
 0x31e   :  { %v2676_v16 = vsel %vm2621_vm5, %v4941_v15, 0.0 }
 0x31f   :  { %v2642_v12 = vpop.xlane.xlu0 %2641  ;;  %v2645_v13 = vpop.xlane.xlu1 %2644  ;;  %2677 = vadd.xlane.f32.xlu0 %v2676_v16 }
 0x320   :  { %v2652_v19 = vsub.f32 %v2541_v45, %v2642_v12  ;;  %v2653_v20 = vsub.f32 %v2617_v46, %v2645_v13 }
 0x321   :  { %v4943_v21 = vpop.eup %4942 }
 0x322   :  { %v2666_v22 = vmul.f32 1.442695, %v2652_v19  ;;  %v2668_v25 = vmul.f32 1.442695, %v2653_v20  ;;  %v2679_v26 = vsel %vm2621_vm5, %v4943_v21, 0.0 }
 0x323   :  { %2680 = vadd.xlane.f32.xlu1 %v2679_v26 }
 0x324   :  { %4948 = vpow2.f32 %v2666_v22 }
 0x325   :  { %4950 = vpow2.f32 %v2668_v25 }
 0x327   :  { %v4945_v27 = vpop.eup %4944 }
 0x328   :  { %v4947_v28 = vpop.eup %4946  ;;  %v2682_v29 = vsel %vm2621_vm5, %v4945_v27, 0.0 }
 0x329   :  { %2683 = vadd.xlane.f32.xlu0 %v2682_v29  ;;  %v2685_v30 = vsel %vm2621_vm5, %v4947_v28, 0.0 }
 0x32a   :  { %2686 = vadd.xlane.f32.xlu1 %v2685_v30 }
 0x331   :  { %v4949_v31 = vpop.eup %4948 }
 0x332   :  { %v4951_v32 = vpop.eup %4950  ;;  %v2688_v33 = vsel %vm2621_vm5, %v4949_v31, 0.0 }
 0x333   :  { %2689 = vadd.xlane.f32.xlu0 %v2688_v33  ;;  %v2691_v34 = vsel %vm2621_vm5, %v4951_v32, 0.0 }
 0x334   :  { %2692 = vadd.xlane.f32.xlu1 %v2691_v34 }
 0x39e   :  { %v2672_v35 = vpop.xlane.xlu0 %2671 }
 0x39f   :  { %4952 = vrcp.f32 %v2672_v35 }
 0x3a2   :  { %v2675_v36 = vpop.xlane.xlu1 %2674 }
 0x3a3   :  { %4954 = vrcp.f32 %v2675_v36 }
 0x3a8   :  { %v2678_v37 = vpop.xlane.xlu0 %2677 }
 0x3a9   :  { %4956 = vrcp.f32 %v2678_v37 }
 0x3ac   :  { %v4953_v38 = vpop.eup %4952  ;;  %v2681_v39 = vpop.xlane.xlu1 %2680 }
 0x3ad   :  { %4958 = vrcp.f32 %v2681_v39  ;;  %v2702_v40 = vmul.f32 %v4953_v38, %v4937_v0 }
 0x3af   :  { %4824 = vmatmul.mubr.msk.f32.vlgmr.msra.gmra.mxu1 %vm2621_vm5, %v2702_v40 }
 0x3b0   :  { %v4955_v41 = vpop.eup %4954  ;;  %4832 = vmatpush3.msra.mxu1 %v5691_v6  ;;  %4833 = vmatprep.mubr.msk.f32.mxu1 %vm4995_vm1, %v4994_v3 }
 0x3b1   :  { %v2703_v42 = vmul.f32 %v4955_v41, %v4939_v8  ;;  %4841 = vmatprep.subr.mxu1 %v4994_v3  ;;  %v3301_v8 = vld [vmem:[%s5912_s3 + $0x1c] sm:$0xf] }
 0x3b2   :  { %v2684_v43 = vpop.xlane.xlu0 %2683 }
 0x3b3   :  { %4960 = vrcp.f32 %v2684_v43  ;;  %v2687_v44 = vpop.xlane.xlu1 %2686  ;;  %4829 = vmatmul.mubr.msk.f32.vlgmr.msra.gmra.mxu0 %vm2621_vm5, %v2703_v42 }
 0x3b4   :  { %4962 = vrcp.f32 %v2687_v44  ;;  %4837 = vmatpush3.msra.mxu0 %v5693_v7  ;;  %4838 = vmatprep.mubr.msk.f32.mxu0 %vm4995_vm1, %v4994_v3 }
 0x3b5   :  { %4846 = vmatprep.subr.mxu0 %v4994_v3 }
 0x3b6   :  { %v4957_v6 = vpop.eup %4956 }
 0x3b7   :  { %v2704_v45 = vmul.f32 %v4957_v6, %v4941_v15 }
 0x3b9   :  { %4834 = vmatmul.mubr.msk.f32.vlgmr.msra.gmra.mxu1 %vm2621_vm5, %v2704_v45 }
 0x3ba   :  { %v4959_v46 = vpop.eup %4958  ;;  %4842 = vmatpush3.msra.mxu1 %v5697_v17  ;;  %4843 = vmatprep.mubr.msk.f32.mxu1 %vm4995_vm1, %v4994_v3 }
 0x3bb   :  { %v2705_v47 = vmul.f32 %v4959_v46, %v4943_v21  ;;  %4851 = vmatprep.subr.mxu1 %v4994_v3 }
 0x3bc   :  { %v2690_v48 = vpop.xlane.xlu0 %2689 }
 0x3bd   :  { %4964 = vrcp.f32 %v2690_v48  ;;  %v2693_v7 = vpop.xlane.xlu1 %2692  ;;  %4839 = vmatmul.mubr.msk.f32.vlgmr.msra.gmra.mxu0 %vm2621_vm5, %v2705_v47 }
 0x3be   :  { %4966 = vrcp.f32 %v2693_v7  ;;  %4847 = vmatpush3.msra.mxu0 %v5699_v18  ;;  %4848 = vmatprep.mubr.msk.f32.mxu0 %vm4995_vm1, %v4994_v3  ;;  %v4319_v7 = vld [vmem:[%s5916_s7 + $0x1] ss:$0 sm:$0xff] }
 0x3bf   :  { %4856 = vmatprep.subr.mxu0 %v4994_v3 }
 0x3c0   :  { %v4961_v17 = vpop.eup %4960 }
 0x3c1   :  { %v4963_v49 = vpop.eup %4962  ;;  %v2706_v50 = vmul.f32 %v4961_v17, %v4945_v27 }
 0x3c2   :  { %v2707_v51 = vmul.f32 %v4963_v49, %v4947_v28 }
 0x3c3   :  { %4844 = vmatmul.mubr.msk.f32.vlgmr.msra.gmra.mxu1 %vm2621_vm5, %v2706_v50 }
 0x3c4   :  { %4849 = vmatmul.mubr.msk.f32.vlgmr.msra.gmra.mxu0 %vm2621_vm5, %v2707_v51  ;;  %4852 = vmatpush3.msra.mxu1 %v5701_v23  ;;  %v3294_v23 = vld [vmem:[%s5912_s3] sm:$0xf] }
 0x3c5   :  { %4857 = vmatpush3.msra.mxu0 %v5703_v24  ;;  %4853 = vmatprep.mubr.msk.f32.mxu1 %vm4995_vm1, %v4994_v3  ;;  %v3295_v24 = vld [vmem:[%s5912_s3 + $0x4] sm:$0xf] }
 0x3c6   :  { %4858 = vmatprep.mubr.msk.f32.mxu0 %vm4995_vm1, %v4994_v3  ;;  %4861 = vmatprep.subr.mxu1 %v4994_v3 }
 0x3c7   :  { %4866 = vmatprep.subr.mxu0 %v4994_v3 }
 0x3ca   :  { %v4965_v18 = vpop.eup %4964 }
 0x3cb   :  { %v4967_v52 = vpop.eup %4966  ;;  %v2708_v53 = vmul.f32 %v4965_v18, %v4949_v31 }
 0x3cc   :  { %v2709_v54 = vmul.f32 %v4967_v52, %v4951_v32 }
 0x3cd   :  { %4854 = vmatmul.mubr.msk.f32.vlgmr.msra.gmra.mxu1 %vm2621_vm5, %v2708_v53 }
 0x3ce   :  { %4859 = vmatmul.mubr.msk.f32.vlgmr.msra.gmra.mxu0 %vm2621_vm5, %v2709_v54  ;;  %4863 = vmatprep.mubr.msk.f32.mxu1 %vm4995_vm1, %v4994_v3 }
 0x3cf   :  { %4868 = vmatprep.mubr.msk.f32.mxu0 %vm4995_vm1, %v4994_v3  ;;  %4862 = vmatpush3.msk.msra.mxu1 %vm3305_vm6, %v3294_v23 }
 0x3d0   :  { %4871 = vmatprep.subr.mxu1 %v4994_v3  ;;  %4867 = vmatpush3.msk.msra.mxu0 %vm3305_vm6, %v3295_v24 }
 0x3d1   :  { %4876 = vmatprep.subr.mxu0 %v4994_v3 }
 0x46f   :  { %v2779_v59 = vpop.f32.mrf.mxu1 }
 0x470   :  { %4864 = vmatmul.mubr.msk.f32.vlgmr.msra.gmra.mxu1 %vm2012_vm4, %v2779_v59  ;;  %v3961_v59 = vld [vmem:[%s5913_s4 + $0x10] sm:$0xff] }
 0x471   :  { %v4825_v60 = vpop.f32.mrf.mxu1  ;;  %4872 = vmatpush3.msk.msra.mxu1 %vm3305_vm6, %v3296_v58  ;;  %4873 = vmatprep.mubr.msk.f32.mxu1 %vm4995_vm1, %v4994_v3  ;;  %v3962_v58 = vld [vmem:[%s5913_s4 + $0x18] sm:$0xff] }
 0x472   :  { %4881 = vmatprep.subr.mxu1 %v4994_v3  ;;  %v3959_v60 = vld [vmem:[%s5913_s4] sm:$0xff] }
 0x473   :  { %v2852_v55 = vpop.f32.mrf.mxu0 }
 0x474   :  { %4869 = vmatmul.mubr.msk.f32.vlgmr.msra.gmra.mxu0 %vm2012_vm4, %v2852_v55  ;;  %v4050_v55 = vld [vmem:[%s5914_s5 + $0x30] sm:$0xff] }
 0x475   :  { %v4830_v56 = vpop.f32.mrf.mxu0  ;;  %4877 = vmatpush3.msk.msra.mxu0 %vm3305_vm6, %v3297_v62  ;;  %4878 = vmatprep.mubr.msk.f32.mxu0 %vm4995_vm1, %v4994_v3  ;;  %v4051_v62 = vld [vmem:[%s5914_s5 + $0x38] sm:$0xff] }
 0x476   :  { %4886 = vmatprep.subr.mxu0 %v4994_v3  ;;  %v4049_v56 = vld [vmem:[%s5914_s5 + $0x28] sm:$0xff] }
 0x479   :  { %v2925_v63 = vpop.f32.mrf.mxu1 }
 0x47a   :  { %4874 = vmatmul.mubr.msk.f32.vlgmr.msra.gmra.mxu1 %vm2012_vm4, %v2925_v63  ;;  %v4047_v63 = vld [vmem:[%s5914_s5 + $0x18] sm:$0xff] }
 0x47b   :  { %v4835_v0 = vpop.f32.mrf.mxu1  ;;  %4882 = vmatpush3.msk.msra.mxu1 %vm3305_vm6, %v3298_v57  ;;  %4883 = vmatprep.mubr.msk.f32.mxu1 %vm4995_vm1, %v4994_v3  ;;  %v4048_v57 = vld [vmem:[%s5914_s5 + $0x20] sm:$0xff] }
 0x47c   :  { %4891 = vmatprep.subr.mxu1 %v4994_v3 }
 0x47d   :  { %v2998_v61 = vpop.f32.mrf.mxu0 }
 0x47e   :  { %4879 = vmatmul.mubr.msk.f32.vlgmr.msra.gmra.mxu0 %vm2012_vm4, %v2998_v61 }
 0x47f   :  { %v4840_v1 = vpop.f32.mrf.mxu0  ;;  %4887 = vmatpush3.msk.msra.mxu0 %vm3305_vm6, %v3299_v2  ;;  %4888 = vmatprep.mubr.msk.f32.mxu0 %vm4995_vm1, %v4994_v3 }
 0x480   :  { %4896 = vmatprep.subr.mxu0 %v4994_v3 }
 0x483   :  { %v3071_v5 = vpop.f32.mrf.mxu1 }
 0x484   :  { %v3144_v9 = vpop.f32.mrf.mxu0  ;;  %4884 = vmatmul.mubr.msk.f32.vlgmr.msra.gmra.mxu1 %vm2012_vm4, %v3071_v5 }
 0x485   :  { %4889 = vmatmul.mubr.msk.f32.vlgmr.msra.gmra.mxu0 %vm2012_vm4, %v3144_v9  ;;  %v4845_v10 = vpop.f32.mrf.mxu1  ;;  %4892 = vmatpush3.msk.msra.mxu1 %vm3305_vm6, %v3300_v4  ;;  %v4320_v4 = vld [vmem:[%s5916_s7 + $0x2] ss:$0 sm:$0xff] }
 0x486   :  { %v4850_v11 = vpop.f32.mrf.mxu0  ;;  %4893 = vmatprep.mubr.msk.f32.mxu1 %vm4995_vm1, %v4994_v3  ;;  %4897 = vmatpush3.msk.msra.mxu0 %vm3305_vm6, %v3301_v8  ;;  %v4321_v8 = vld [vmem:[%s5916_s7 + $0x3] ss:$0 sm:$0xff] }
 0x487   :  { %4898 = vmatprep.mubr.msk.f32.mxu0 %vm4995_vm1, %v4994_v3  ;;  %4901 = vmatprep.subr.mxu1 %v4994_v3  ;;  %v4046_v11 = vld [vmem:[%s5914_s5 + $0x10] sm:$0xff] }
 0x488   :  { %4912 = vmatprep.subr.mxu0 %v4994_v3 }
 0x48d   :  { %v3217_v15 = vpop.f32.mrf.mxu1 }
 0x48e   :  { %v3290_v16 = vpop.f32.mrf.mxu0  ;;  %4894 = vmatmul.mubr.msk.f32.vlgmr.msra.gmra.mxu1 %vm2012_vm4, %v3217_v15  ;;  %v4045_v15 = vld [vmem:[%s5914_s5 + $0x8] sm:$0xff] }
 0x48f   :  { %4899 = vmatmul.mubr.msk.f32.vlgmr.msra.gmra.mxu0 %vm2012_vm4, %v3290_v16  ;;  %v4855_v12 = vpop.f32.mrf.mxu1  ;;  %4909 = vmatprep.mubr.msk.f32.mxu1 %vm4995_vm1, %v4994_v3  ;;  %v4044_v16 = vld [vmem:[%s5914_s5] sm:$0xff] }
 0x490   :  { %v4860_v13 = vpop.f32.mrf.mxu0  ;;  %4928 = vmatprep.mubr.msk.f32.mxu0 %vm4995_vm1, %v4994_v3  ;;  %4902 = vmatpush3.msra.mxu1 %v3962_v58  ;;  %v4322_v12 = vld [vmem:[%s5918_s9] ss:$0 sm:$0xff] }
 0x491   :  { %4903 = vmatprep.subr.mxu1 %v4994_v3  ;;  %4913 = vmatpush3.msra.mxu0 %v4051_v62 }
 0x492   :  { %4904 = vmatpush3.msra.mxu1 %v3961_v59  ;;  %4914 = vmatprep.subr.mxu0 %v4994_v3 }
 0x493   :  { %4905 = vmatprep.subr.mxu1 %v4994_v3  ;;  %4915 = vmatpush3.msra.mxu0 %v4050_v55 }
 0x494   :  { %4916 = vmatprep.subr.mxu0 %v4994_v3 }
 0x495   :  { %4917 = vmatpush3.msra.mxu0 %v4049_v56 }
 0x496   :  { %4918 = vmatprep.subr.mxu0 %v4994_v3 }
 0x497   :  { %4919 = vmatpush3.msra.mxu0 %v4048_v57 }
 0x498   :  { %4920 = vmatprep.subr.mxu0 %v4994_v3 }
 0x499   :  { %4921 = vmatpush3.msra.mxu0 %v4047_v63 }
 0x49a   :  { %4922 = vmatprep.subr.mxu0 %v4994_v3 }
 0x49b   :  { %4923 = vmatpush3.msra.mxu0 %v4046_v11 }
 0x49c   :  { %4924 = vmatprep.subr.mxu0 %v4994_v3 }
 0x49d   :  { %4925 = vmatpush3.msra.mxu0 %v4045_v15 }
 0x49e   :  { %4926 = vmatprep.subr.mxu0 %v4994_v3 }
 0x49f   :  { %4927 = vmatpush3.msra.mxu0 %v4044_v16 }
 0x530   :  { %v3375_v19 = vpop.f32.mrf.mxu1 }
 0x531   :  { %v3911_v30 = vsel %vm198_vm3, %v3375_v19, 0.0 }
 0x532   :  { %v4865_v20 = vpop.f32.mrf.mxu1 }
 0x534   :  { %v3451_v21 = vpop.f32.mrf.mxu0 }
 0x535   :  { %v3912_v29 = vsel %vm198_vm3, %v3451_v21, 0.0 }
 0x536   :  { %v4870_v22 = vpop.f32.mrf.mxu0  ;;  %v3913_v32 = vadd.f32 %v3912_v29, %v3911_v30 }
 0x537   :  { %v4324_v22 = vld [vmem:[%s5916_s7 + $0x4] ss:$0 sm:$0xff] }
 0x53a   :  { %v3527_v25 = vpop.f32.mrf.mxu1 }
 0x53b   :  { %v3914_v31 = vsel %vm198_vm3, %v3527_v25, 0.0 }
 0x53c   :  { %v4875_v26 = vpop.f32.mrf.mxu1  ;;  %v3915_v36 = vadd.f32 %v3914_v31, %v3913_v32 }
 0x53e   :  { %v3603_v27 = vpop.f32.mrf.mxu0 }
 0x53f   :  { %v3916_v34 = vsel %vm198_vm3, %v3603_v27, 0.0 }
 0x540   :  { %v4880_v28 = vpop.f32.mrf.mxu0  ;;  %v3917_v40 = vadd.f32 %v3916_v34, %v3915_v36 }
 0x544   :  { %v3679_v33 = vpop.f32.mrf.mxu1 }
 0x545   :  { %v3755_v35 = vpop.f32.mrf.mxu0  ;;  %v3918_v38 = vsel %vm198_vm3, %v3679_v33, 0.0 }
 0x546   :  { %v4885_v37 = vpop.f32.mrf.mxu1  ;;  %v3919_v41 = vadd.f32 %v3918_v38, %v3917_v40  ;;  %v3920_v42 = vsel %vm198_vm3, %v3755_v35, 0.0  ;;  %v4326_v38 = vld [vmem:[%s5916_s7 + $0x5] ss:$0 sm:$0xff]  ;;  %v4327_v40 = vld [vmem:[%s5916_s7 + $0x6] ss:$0 sm:$0xff]  ;;  %s4996_s7 = smov [#allocation3]  }
 0x547   :  { %v4890_v39 = vpop.f32.mrf.mxu0  ;;  %s4180_s14 = sshll.u32 %s4996_s7, 4  ;;  %s4181_s14 = int_to_ptr.vmem [resolvable:$true] %s4180_s14 }
 0x548   :  { %v3921_v43 = vadd.f32 %v3920_v42, %v3919_v41  ;;  %v4157_v42 = vld [vmem:[%s5915_s6] sm:$0xff]  ;;  %s4972_s6 = scalar_lea.vmem %s4181_s14, 16  ;;  %s4976_s16 = scalar_lea.vmem %s4181_s14, 32 }
 0x549   :  { %p4973_p0 = scmp.ne.s32.totalorder %s4181_s14, %s4972_s6  ;;  %p4977_p1 = scmp.lt.s32.totalorder %s4181_s14, %s4181_s14 }
 0x54a   :  { %p4978_p2 = scmp.lt.s32.totalorder %s4976_s16, %s4972_s6 }
 0x54c   :  { %p4979_p3 = por %p4978_p2, %p4977_p1 }
 0x54e   :  { %v3831_v44 = vpop.f32.mrf.mxu1  ;;  %p4980_p4 = pnand %p4979_p3, %p4973_p0 }
 0x54f   :  { %v3922_v6 = vsel %vm198_vm3, %v3831_v44, 0.0  ;;  %v3907_v45 = vpop.f32.mrf.mxu0 }
 0x550   :  { %v3923_v46 = vadd.f32 %v3922_v6, %v3921_v43  ;;  %v4895_v47 = vpop.f32.mrf.mxu1  ;;  %v3924_v48 = vsel %vm198_vm3, %v3907_v45, 0.0 }
 0x551   :  { %v4900_v17 = vpop.f32.mrf.mxu0 }
 0x552   :  { %v3925_v49 = vadd.f32 %v3924_v48, %v3923_v46 }
 0x554   :  { %v3931_v50 = vadd.f32 %v4319_v7, %v3925_v49 }
 0x556   :  { %v3932_v51 = vadd.f32 %v3931_v50, %v5110_v14  ;;  %v3960_v14 = vld [vmem:[%s5913_s4 + $0x8] sm:$0xff]  ;;  %v4170_v50 = vld [vmem:[#allocation2] sm:$0x1] }
 0x557   :  { %4906 = vmatpush3.msra.mxu1 %v3960_v14 }
 0x558   :  { %v3933_v18 = vsel %vm198_vm3, %v3932_v51, 0.0  ;;  %4907 = vmatprep.subr.mxu1 %v4994_v3 }
 0x559   :  { %3934 = vadd.xlane.f32.xlu0 %v3933_v18  ;;  %4908 = vmatpush3.msra.mxu1 %v3959_v60 }
 0x5e2   :  { %v3935_v52 = vpop.xlane.xlu0 %3934 }
 0x5e3   :  { %v3937_v53 = vmul.f32 0.03125, %v3935_v52 }
 0x5e5   :  { %v3938_v54 = vsub.f32 %v3932_v51, %v3937_v53 }
 0x5e7   :  { %v3939_v23 = vmul.f32 %v3938_v54, %v3938_v54 }
 0x5e9   :  { %v3940_v24 = vsel %vm198_vm3, %v3939_v23, 0.0 }
 0x5ea   :  { %3941 = vadd.xlane.f32.xlu1 %v3940_v24 }
 0x673   :  { %v3942_v0 = vpop.xlane.xlu1 %3941 }
 0x674   :  { %v3943_v2 = vmul.f32 0.03125, %v3942_v0 }
 0x676   :  { %v3944_v61 = vadd.f32 1e-05, %v3943_v2 }
 0x678   :  { %4968 = vrsqrt.f32 %v3944_v61 }
 0x685   :  { %v4969_v1 = vpop.eup %4968 }
 0x686   :  { %v3946_v5 = vmul.f32 %v4969_v1, %v3938_v54 }
 0x688   :  { %v3952_v9 = vmul.f32 %v4320_v4, %v3946_v5 }
 0x68a   :  { %v3958_v10 = vadd.f32 %v4321_v8, %v3952_v9 }
 0x68c   :  { %4910 = vmatmul.mubr.msk.f32.vlgmr.msra.gmra.mxu1 %vm198_vm3, %v3958_v10 }
 0x74c   :  { %v4039_v13 = vpop.f32.mrf.mxu1 }
 0x74d   :  { %v4040_v19 = vadd.f32 %v4322_v12, %v4039_v13 }
 0x74e   :  { %v4911_v20 = vpop.f32.mrf.mxu1 }
 0x74f   :  { %v4043_v21 = vmax.f32 %v4040_v19, 0.0 }
 0x751   :  { %4929 = vmatmul.mubr.msk.f32.vlgmr.msra.gmra.mxu0 %vm4057_vm7, %v4043_v21 }
 0x811   :  { %v4127_v25 = vpop.f32.mrf.mxu0 }
 0x812   :  { %v4128_v26 = vadd.f32 %v4324_v22, %v4127_v25 }
 0x813   :  { %v4930_v27 = vpop.f32.mrf.mxu0 }
 0x814   :  { %v4131_v28 = vadd.f32 %v4128_v26, %v3958_v10 }
 0x816   :  { %v4132_v3 = vsel %vm198_vm3, %v4131_v28, 0.0 }
 0x817   :  { %4133 = vadd.xlane.f32.xlu0 %v4132_v3 }
 0x8a0   :  { %v4134_v29 = vpop.xlane.xlu0 %4133 }
 0x8a1   :  { %v4135_v30 = vmul.f32 0.03125, %v4134_v29 }
 0x8a3   :  { %v4136_v31 = vsub.f32 %v4131_v28, %v4135_v30 }
 0x8a5   :  { %v4137_v32 = vmul.f32 %v4136_v31, %v4136_v31 }
 0x8a7   :  { %v4138_v33 = vsel %vm198_vm3, %v4137_v32, 0.0 }
 0x8a8   :  { %4139 = vadd.xlane.f32.xlu1 %v4138_v33 }
 0x931   :  { %v4140_v34 = vpop.xlane.xlu1 %4139 }
 0x932   :  { %v4141_v35 = vmul.f32 0.03125, %v4140_v34 }
 0x934   :  { %v4142_v36 = vadd.f32 1e-05, %v4141_v35 }
 0x936   :  { %4970 = vrsqrt.f32 %v4142_v36 }
 0x943   :  { %v4971_v37 = vpop.eup %4970 }
 0x944   :  { %v4144_v39 = vmul.f32 %v4971_v37, %v4136_v31 }
 0x946   :  { %v4150_v41 = vmul.f32 %v4326_v38, %v4144_v39 }
 0x948   :  { %v4156_v43 = vadd.f32 %v4327_v40, %v4150_v41 }
 0x94a   :  { %v4158_v44 = vmul.f32 %v4157_v42, %v4156_v43 }
 0x94c   :  { %v4159_v6 = vsel %vm198_vm3, %v4158_v44, 0.0 }
 0x94d   :  { %4160 = vadd.xlane.f32.xlu0 %v4159_v6 }
 0x9d6   :  { %v4161_v45 = vpop.xlane.xlu0 %4160 }
 0x9d7   :  { %v4162_v46 = vrot.slane %v4161_v45, 4 }
 0x9d9   :  { %v4163_v47 = vadd.f32 %v4162_v46, %v4161_v45 }
 0x9db   :  { %v4164_v48 = vrot.slane %v4163_v47, 2 }
 0x9dd   :  { %v4165_v7 = vadd.f32 %v4164_v48, %v4163_v47 }
 0x9df   :  { %v4166_v17 = vrot.slane %v4165_v7, 1 }
 0x9e1   :  { %v4167_v49 = vadd.f32 %v4166_v17, %v4165_v7 }
 0x9e3   :  { %4931 = vpush %v4167_v49 }
 0xa14   :  { %s4932_s15 = spop %4931 }
 0xa15   :  { %v4169_v51 = vstv %s4932_s15 }
 0xa16   :  { %v4171_v18 = vadd.f32 %v4170_v50, %v4169_v51 }
 0xa18   :  { %4173 = vst.msk [vmem:[#allocation3] sm:$0x1] %vm4172_vm8, %v4171_v18 }
 0xa19   :  { %4983 = shalt.err (!%p4980_p4)
}
 0xa1a   :  { %4183 = dma.vmem_to_hbm [thread:$0]  %s4181_s14, 16, %s5920_s11, [#allocation4]  }
 0xa1b   :  { %4992 = dma.done.wait [#allocation4], 16  }
 0xa1c   :  { %4993 = vsyncadd [#allocation4], 4294967280 }
 0xa1d   :  { %4187 = vsyncpa [#allocation4], 1 }

</bundles_post_ra>
